<compile_context>
chip_gen: v5e
topology: v5e:2x2
jax: 0.10.0
libtpu: 0.0.40
codegen_flags: <defaults>
</compile_context>

<pallas_src>
import functools

import jax
import jax.numpy as jnp
from jax.experimental import pallas as pl
from jax.experimental.pallas import tpu as pltpu

K = 7
PAD = K // 2


def _spatial_attention_kernel(w_ref, b_ref, rowm_ref, colm_ref, x_ref, o_ref,
                              avg_ref, mx_ref, *, Bb, C, W, HW, HWpad):
    # w_ref   : SMEM (2*K*K,) flattened conv weight (OIHW, O=1 squeezed)
    # b_ref   : SMEM (1,)     conv bias
    # rowm_ref: VMEM (K, HWpad) f32 vertical border masks (per ky)
    # colm_ref: VMEM (K, HWpad) f32 horizontal border masks (per kx)
    # x_ref   : VMEM (Bb, C, HW) lane-dense input block (unpadded)
    # o_ref   : VMEM (Bb, C, HW) lane-dense output block
    # avg_ref : VMEM (1, HWpad) f32 scratch (mean descriptor, padded)
    # mx_ref  : VMEM (1, HWpad) f32 scratch (max descriptor, padded)
    inv_c = jnp.float32(1.0 / C)
    padded = HWpad != HW

    if padded:
        # Zero once per grid step so masked (zero-weighted) taps never touch
        # non-finite garbage in the padded tail; rows only overwrite [:, :HW].
        avg_ref[...] = jnp.zeros_like(avg_ref)
        mx_ref[...] = jnp.zeros_like(mx_ref)

    # Loop-invariant scalar reads (cheap sld from SMEM).
    w_a = [[w_ref[ky * K + kx] for kx in range(K)] for ky in range(K)]
    w_m = [[w_ref[K * K + ky * K + kx] for kx in range(K)] for ky in range(K)]
    bias = b_ref[0]

    def process_row(b):
        xb = x_ref[b]                                              # (C, HW)

        # --- channel descriptors: mean (f32 accumulation) & max (exact) -----
        mean_row = jnp.sum(xb, axis=0, keepdims=True,
                           dtype=jnp.float32) * inv_c              # (1, HW)
        max_row = jnp.max(xb, axis=0, keepdims=True
                          ).astype(jnp.float32)                    # (1, HW)
        if padded:
            avg_ref[:, pl.ds(0, HW)] = mean_row
            mx_ref[:, pl.ds(0, HW)] = max_row
            avg = avg_ref[...]                                     # (1, HWpad)
            mxv = mx_ref[...]
        else:
            avg, mxv = mean_row, max_row                           # HW == HWpad

        # --- factored 7x7 "same" conv -----------------------------------
        # 7 pre-masked column shifts per descriptor (14 lane rolls total).
        a_sh, m_sh = [], []
        for kx in range(K):
            sh = (-(kx - PAD)) % HWpad
            cm = colm_ref[kx]                                      # (HWpad,)
            ra = avg if sh == 0 else pltpu.roll(avg, sh, axis=1)
            rm = mxv if sh == 0 else pltpu.roll(mxv, sh, axis=1)
            a_sh.append(ra * cm)
            m_sh.append(rm * cm)

        # Per-ky inner sums on the VPU, then ONE row roll each (7 rolls).
        acc0 = jnp.zeros((1, HWpad), jnp.float32)
        acc1 = jnp.zeros((1, HWpad), jnp.float32)
        for ky in range(K):
            p0 = a_sh[0] * w_a[ky][0] + m_sh[0] * w_m[ky][0]
            p1 = a_sh[1] * w_a[ky][1] + m_sh[1] * w_m[ky][1]
            for kx in range(2, K):
                t = a_sh[kx] * w_a[ky][kx] + m_sh[kx] * w_m[ky][kx]
                if kx % 2 == 0:
                    p0 = p0 + t
                else:
                    p1 = p1 + t
            inner = p0 + p1
            sh = (-((ky - PAD) * W)) % HWpad
            r = inner if sh == 0 else pltpu.roll(inner, sh, axis=1)
            contrib = rowm_ref[ky] * r                             # (1, HWpad)
            if ky % 2 == 0:
                acc0 = acc0 + contrib
            else:
                acc1 = acc1 + contrib

        gate = jax.nn.sigmoid(acc0 + acc1 + bias)                  # (1, HWpad) f32
        g = gate if not padded else gate[:, :HW]                   # (1, HW)

        # --- gate multiply (f32 via promotion), single cast at the store ----
        o_ref[b] = (x_ref[b] * g).astype(o_ref.dtype)

    if Bb == 1:
        process_row(0)
    else:
        def loop_body(b, carry):
            process_row(b)
            return carry
        jax.lax.fori_loop(0, Bb, loop_body, 0)


def spatial_attention(x, weight, bias, *, target_block_bytes=2 << 20):
    """x: (B, C, H, W); weight: (1, 2, K, K); bias: (1,)."""
    B, C, H, W = x.shape
    HW = H * W
    HWpad = ((HW + 127) // 128) * 128

    # Lane-dense flat layout -- no host-side pad, no output un-pad slice.
    x_flat = x.reshape(B, C, HW)

    # Border masks on the flat index, factored row(ky) x col(kx).  They also
    # zero every tap whose flat roll would wrap, so period-HWpad rolls are
    # exact for all stored lanes p < HW.
    f = jnp.arange(HWpad, dtype=jnp.int32)
    row, col = f // W, f % W
    dk = jnp.arange(K, dtype=jnp.int32) - PAD
    row_mask = ((row[None, :] + dk[:, None] >= 0)
                & (row[None, :] + dk[:, None] < H)).astype(jnp.float32)
    col_mask = ((col[None, :] + dk[:, None] >= 0)
                & (col[None, :] + dk[:, None] < W)).astype(jnp.float32)

    w_flat = weight.reshape(-1).astype(jnp.float32)   # (2*K*K,)
    b = bias.astype(jnp.float32)                      # (1,)

    # Batch tile: near target_block_bytes (double-buffered in+out blocks stay
    # inside default scoped VMEM on every generation), while keeping at least
    # min(B, 4) grid steps so pipelining overlaps and v7x's two TensorCores
    # both get work on the "parallel" batch axis.
    per_b = C * HW * x.dtype.itemsize
    bb_cap_size = max(1, int(target_block_bytes) // max(per_b, 1))
    min_steps = min(B, 4)
    bb_cap_steps = max(1, B // min_steps)
    bb_cap = max(1, min(B, bb_cap_size, bb_cap_steps))
    Bb = max(d for d in range(1, bb_cap + 1) if B % d == 0)
    grid = (B // Bb,)

    kernel = functools.partial(_spatial_attention_kernel,
                               Bb=Bb, C=C, W=W, HW=HW, HWpad=HWpad)
    out_flat = pl.pallas_call(
        kernel,
        out_shape=jax.ShapeDtypeStruct((B, C, HW), x.dtype),
        grid_spec=pltpu.PrefetchScalarGridSpec(
            num_scalar_prefetch=0,
            grid=grid,
            in_specs=[
                pl.BlockSpec(memory_space=pltpu.MemorySpace.SMEM),   # weight
                pl.BlockSpec(memory_space=pltpu.MemorySpace.SMEM),   # bias
                pl.BlockSpec((K, HWpad), lambda i: (0, 0)),          # row masks
                pl.BlockSpec((K, HWpad), lambda i: (0, 0)),          # col masks
                pl.BlockSpec((Bb, C, HW), lambda i: (i, 0, 0)),      # x
            ],
            out_specs=pl.BlockSpec((Bb, C, HW), lambda i: (i, 0, 0)),
            scratch_shapes=[pltpu.VMEM((1, HWpad), jnp.float32),     # avg map
                            pltpu.VMEM((1, HWpad), jnp.float32)],    # max map
        ),
        compiler_params=pltpu.CompilerParams(
            dimension_semantics=("parallel",)),
        cost_estimate=pl.CostEstimate(
            flops=int(B * (3 * C * HW + 230 * HWpad)),
            transcendentals=int(B * HWpad),
            bytes_accessed=int(2 * B * C * HW * x.dtype.itemsize
                               + 2 * K * HWpad * 4),
        ),
    )(w_flat, b, row_mask, col_mask, x_flat)

    return out_flat.reshape(B, C, H, W)


def spatial_attention_reference(x, weight, bias):
    """Pure-JAX reference (mirrors the PyTorch forward) for validation."""
    avg = jnp.mean(x, axis=1, keepdims=True)
    mx = jnp.max(x, axis=1, keepdims=True)
    concat = jnp.concatenate([avg, mx], axis=1)
    y = jax.lax.conv_general_dilated(
        concat, weight, window_strides=(1, 1),
        padding=[(PAD, PAD), (PAD, PAD)],
        dimension_numbers=("NCHW", "OIHW", "NCHW"))
    y = y + bias.reshape(1, 1, 1, 1)
    return x * jax.nn.sigmoid(y)


if __name__ == "__main__":
    key = jax.random.PRNGKey(0)
    kx, kw, kb = jax.random.split(key, 3)

    B, C, H, W = 2, 4, 16, 16
    x = jax.random.normal(kx, (B, C, H, W), dtype=jnp.float32)

    # Deterministic synthetic Conv2d(2, 1, 7, padding=3) parameters.
    fan_in = 2 * K * K
    bound = 1.0 / (fan_in ** 0.5)
    weight = jax.random.uniform(kw, (1, 2, K, K), jnp.float32, -bound, bound)
    bias = jax.random.uniform(kb, (1,), jnp.float32, -bound, bound)

    out = jax.block_until_ready(spatial_attention(x, weight, bias))
    ref = jax.block_until_ready(spatial_attention_reference(x, weight, bias))

    assert out.shape == x.shape and out.dtype == x.dtype
    assert jnp.allclose(out, ref, atol=1e-5, rtol=1e-5), "mismatch vs reference"
    print("KERNEL_OK")
</pallas_src>

<mosaic_0001>
module attributes {stable_mosaic.version = 11 : i64} {
  func.func @_spatial_attention_kernel(%arg0: i32, %arg1: memref<98xf32, #tpu.memory_space<smem>>, %arg2: memref<1xf32, #tpu.memory_space<smem>>, %arg3: memref<7x256xf32, #tpu.memory_space<vmem>>, %arg4: memref<7x256xf32, #tpu.memory_space<vmem>>, %arg5: memref<1x4x256xf32, #tpu.memory_space<vmem>>, %arg6: memref<1x4x256xf32, #tpu.memory_space<vmem>>, %arg7: memref<1x256xf32, #tpu.memory_space<vmem>>, %arg8: memref<1x256xf32, #tpu.memory_space<vmem>>) attributes {dimension_semantics = [#tpu.dimension_semantics<parallel>], iteration_bounds = array<i64: 2>, scalar_prefetch = 0 : i64, scratch_operands = 2 : i64, tpu.core_type = #tpu.core_type<tc>, window_params = [{transform_indices = @transform_0, window_bounds = array<i64: 98>}, {transform_indices = @transform_1, window_bounds = array<i64: 1>}, {pipeline_mode = #tpu.pipeline_mode<synchronous>, transform_indices = @transform_2, window_bounds = array<i64: 7, 256>}, {pipeline_mode = #tpu.pipeline_mode<synchronous>, transform_indices = @transform_3, window_bounds = array<i64: 7, 256>}, {transform_indices = @transform_4, window_bounds = array<i64: 1, 4, 256>}, {transform_indices = @transform_5, window_bounds = array<i64: 1, 4, 256>}]} {
    %c0 = arith.constant 0 : index
    %0 = memref.load %arg1[%c0] : memref<98xf32, #tpu.memory_space<smem>>
    %c1 = arith.constant 1 : index
    %1 = memref.load %arg1[%c1] : memref<98xf32, #tpu.memory_space<smem>>
    %c2 = arith.constant 2 : index
    %2 = memref.load %arg1[%c2] : memref<98xf32, #tpu.memory_space<smem>>
    %c3 = arith.constant 3 : index
    %3 = memref.load %arg1[%c3] : memref<98xf32, #tpu.memory_space<smem>>
    %c4 = arith.constant 4 : index
    %4 = memref.load %arg1[%c4] : memref<98xf32, #tpu.memory_space<smem>>
    %c5 = arith.constant 5 : index
    %5 = memref.load %arg1[%c5] : memref<98xf32, #tpu.memory_space<smem>>
    %c6 = arith.constant 6 : index
    %6 = memref.load %arg1[%c6] : memref<98xf32, #tpu.memory_space<smem>>
    %c7 = arith.constant 7 : index
    %7 = memref.load %arg1[%c7] : memref<98xf32, #tpu.memory_space<smem>>
    %c8 = arith.constant 8 : index
    %8 = memref.load %arg1[%c8] : memref<98xf32, #tpu.memory_space<smem>>
    %c9 = arith.constant 9 : index
    %9 = memref.load %arg1[%c9] : memref<98xf32, #tpu.memory_space<smem>>
    %c10 = arith.constant 10 : index
    %10 = memref.load %arg1[%c10] : memref<98xf32, #tpu.memory_space<smem>>
    %c11 = arith.constant 11 : index
    %11 = memref.load %arg1[%c11] : memref<98xf32, #tpu.memory_space<smem>>
    %c12 = arith.constant 12 : index
    %12 = memref.load %arg1[%c12] : memref<98xf32, #tpu.memory_space<smem>>
    %c13 = arith.constant 13 : index
    %13 = memref.load %arg1[%c13] : memref<98xf32, #tpu.memory_space<smem>>
    %c14 = arith.constant 14 : index
    %14 = memref.load %arg1[%c14] : memref<98xf32, #tpu.memory_space<smem>>
    %c15 = arith.constant 15 : index
    %15 = memref.load %arg1[%c15] : memref<98xf32, #tpu.memory_space<smem>>
    %c16 = arith.constant 16 : index
    %16 = memref.load %arg1[%c16] : memref<98xf32, #tpu.memory_space<smem>>
    %c17 = arith.constant 17 : index
    %17 = memref.load %arg1[%c17] : memref<98xf32, #tpu.memory_space<smem>>
    %c18 = arith.constant 18 : index
    %18 = memref.load %arg1[%c18] : memref<98xf32, #tpu.memory_space<smem>>
    %c19 = arith.constant 19 : index
    %19 = memref.load %arg1[%c19] : memref<98xf32, #tpu.memory_space<smem>>
    %c20 = arith.constant 20 : index
    %20 = memref.load %arg1[%c20] : memref<98xf32, #tpu.memory_space<smem>>
    %c21 = arith.constant 21 : index
    %21 = memref.load %arg1[%c21] : memref<98xf32, #tpu.memory_space<smem>>
    %c22 = arith.constant 22 : index
    %22 = memref.load %arg1[%c22] : memref<98xf32, #tpu.memory_space<smem>>
    %c23 = arith.constant 23 : index
    %23 = memref.load %arg1[%c23] : memref<98xf32, #tpu.memory_space<smem>>
    %c24 = arith.constant 24 : index
    %24 = memref.load %arg1[%c24] : memref<98xf32, #tpu.memory_space<smem>>
    %c25 = arith.constant 25 : index
    %25 = memref.load %arg1[%c25] : memref<98xf32, #tpu.memory_space<smem>>
    %c26 = arith.constant 26 : index
    %26 = memref.load %arg1[%c26] : memref<98xf32, #tpu.memory_space<smem>>
    %c27 = arith.constant 27 : index
    %27 = memref.load %arg1[%c27] : memref<98xf32, #tpu.memory_space<smem>>
    %c28 = arith.constant 28 : index
    %28 = memref.load %arg1[%c28] : memref<98xf32, #tpu.memory_space<smem>>
    %c29 = arith.constant 29 : index
    %29 = memref.load %arg1[%c29] : memref<98xf32, #tpu.memory_space<smem>>
    %c30 = arith.constant 30 : index
    %30 = memref.load %arg1[%c30] : memref<98xf32, #tpu.memory_space<smem>>
    %c31 = arith.constant 31 : index
    %31 = memref.load %arg1[%c31] : memref<98xf32, #tpu.memory_space<smem>>
    %c32 = arith.constant 32 : index
    %32 = memref.load %arg1[%c32] : memref<98xf32, #tpu.memory_space<smem>>
    %c33 = arith.constant 33 : index
    %33 = memref.load %arg1[%c33] : memref<98xf32, #tpu.memory_space<smem>>
    %c34 = arith.constant 34 : index
    %34 = memref.load %arg1[%c34] : memref<98xf32, #tpu.memory_space<smem>>
    %c35 = arith.constant 35 : index
    %35 = memref.load %arg1[%c35] : memref<98xf32, #tpu.memory_space<smem>>
    %c36 = arith.constant 36 : index
    %36 = memref.load %arg1[%c36] : memref<98xf32, #tpu.memory_space<smem>>
    %c37 = arith.constant 37 : index
    %37 = memref.load %arg1[%c37] : memref<98xf32, #tpu.memory_space<smem>>
    %c38 = arith.constant 38 : index
    %38 = memref.load %arg1[%c38] : memref<98xf32, #tpu.memory_space<smem>>
    %c39 = arith.constant 39 : index
    %39 = memref.load %arg1[%c39] : memref<98xf32, #tpu.memory_space<smem>>
    %c40 = arith.constant 40 : index
    %40 = memref.load %arg1[%c40] : memref<98xf32, #tpu.memory_space<smem>>
    %c41 = arith.constant 41 : index
    %41 = memref.load %arg1[%c41] : memref<98xf32, #tpu.memory_space<smem>>
    %c42 = arith.constant 42 : index
    %42 = memref.load %arg1[%c42] : memref<98xf32, #tpu.memory_space<smem>>
    %c43 = arith.constant 43 : index
    %43 = memref.load %arg1[%c43] : memref<98xf32, #tpu.memory_space<smem>>
    %c44 = arith.constant 44 : index
    %44 = memref.load %arg1[%c44] : memref<98xf32, #tpu.memory_space<smem>>
    %c45 = arith.constant 45 : index
    %45 = memref.load %arg1[%c45] : memref<98xf32, #tpu.memory_space<smem>>
    %c46 = arith.constant 46 : index
    %46 = memref.load %arg1[%c46] : memref<98xf32, #tpu.memory_space<smem>>
    %c47 = arith.constant 47 : index
    %47 = memref.load %arg1[%c47] : memref<98xf32, #tpu.memory_space<smem>>
    %c48 = arith.constant 48 : index
    %48 = memref.load %arg1[%c48] : memref<98xf32, #tpu.memory_space<smem>>
    %c49 = arith.constant 49 : index
    %49 = memref.load %arg1[%c49] : memref<98xf32, #tpu.memory_space<smem>>
    %c50 = arith.constant 50 : index
    %50 = memref.load %arg1[%c50] : memref<98xf32, #tpu.memory_space<smem>>
    %c51 = arith.constant 51 : index
    %51 = memref.load %arg1[%c51] : memref<98xf32, #tpu.memory_space<smem>>
    %c52 = arith.constant 52 : index
    %52 = memref.load %arg1[%c52] : memref<98xf32, #tpu.memory_space<smem>>
    %c53 = arith.constant 53 : index
    %53 = memref.load %arg1[%c53] : memref<98xf32, #tpu.memory_space<smem>>
    %c54 = arith.constant 54 : index
    %54 = memref.load %arg1[%c54] : memref<98xf32, #tpu.memory_space<smem>>
    %c55 = arith.constant 55 : index
    %55 = memref.load %arg1[%c55] : memref<98xf32, #tpu.memory_space<smem>>
    %c56 = arith.constant 56 : index
    %56 = memref.load %arg1[%c56] : memref<98xf32, #tpu.memory_space<smem>>
    %c57 = arith.constant 57 : index
    %57 = memref.load %arg1[%c57] : memref<98xf32, #tpu.memory_space<smem>>
    %c58 = arith.constant 58 : index
    %58 = memref.load %arg1[%c58] : memref<98xf32, #tpu.memory_space<smem>>
    %c59 = arith.constant 59 : index
    %59 = memref.load %arg1[%c59] : memref<98xf32, #tpu.memory_space<smem>>
    %c60 = arith.constant 60 : index
    %60 = memref.load %arg1[%c60] : memref<98xf32, #tpu.memory_space<smem>>
    %c61 = arith.constant 61 : index
    %61 = memref.load %arg1[%c61] : memref<98xf32, #tpu.memory_space<smem>>
    %c62 = arith.constant 62 : index
    %62 = memref.load %arg1[%c62] : memref<98xf32, #tpu.memory_space<smem>>
    %c63 = arith.constant 63 : index
    %63 = memref.load %arg1[%c63] : memref<98xf32, #tpu.memory_space<smem>>
    %c64 = arith.constant 64 : index
    %64 = memref.load %arg1[%c64] : memref<98xf32, #tpu.memory_space<smem>>
    %c65 = arith.constant 65 : index
    %65 = memref.load %arg1[%c65] : memref<98xf32, #tpu.memory_space<smem>>
    %c66 = arith.constant 66 : index
    %66 = memref.load %arg1[%c66] : memref<98xf32, #tpu.memory_space<smem>>
    %c67 = arith.constant 67 : index
    %67 = memref.load %arg1[%c67] : memref<98xf32, #tpu.memory_space<smem>>
    %c68 = arith.constant 68 : index
    %68 = memref.load %arg1[%c68] : memref<98xf32, #tpu.memory_space<smem>>
    %c69 = arith.constant 69 : index
    %69 = memref.load %arg1[%c69] : memref<98xf32, #tpu.memory_space<smem>>
    %c70 = arith.constant 70 : index
    %70 = memref.load %arg1[%c70] : memref<98xf32, #tpu.memory_space<smem>>
    %c71 = arith.constant 71 : index
    %71 = memref.load %arg1[%c71] : memref<98xf32, #tpu.memory_space<smem>>
    %c72 = arith.constant 72 : index
    %72 = memref.load %arg1[%c72] : memref<98xf32, #tpu.memory_space<smem>>
    %c73 = arith.constant 73 : index
    %73 = memref.load %arg1[%c73] : memref<98xf32, #tpu.memory_space<smem>>
    %c74 = arith.constant 74 : index
    %74 = memref.load %arg1[%c74] : memref<98xf32, #tpu.memory_space<smem>>
    %c75 = arith.constant 75 : index
    %75 = memref.load %arg1[%c75] : memref<98xf32, #tpu.memory_space<smem>>
    %c76 = arith.constant 76 : index
    %76 = memref.load %arg1[%c76] : memref<98xf32, #tpu.memory_space<smem>>
    %c77 = arith.constant 77 : index
    %77 = memref.load %arg1[%c77] : memref<98xf32, #tpu.memory_space<smem>>
    %c78 = arith.constant 78 : index
    %78 = memref.load %arg1[%c78] : memref<98xf32, #tpu.memory_space<smem>>
    %c79 = arith.constant 79 : index
    %79 = memref.load %arg1[%c79] : memref<98xf32, #tpu.memory_space<smem>>
    %c80 = arith.constant 80 : index
    %80 = memref.load %arg1[%c80] : memref<98xf32, #tpu.memory_space<smem>>
    %c81 = arith.constant 81 : index
    %81 = memref.load %arg1[%c81] : memref<98xf32, #tpu.memory_space<smem>>
    %c82 = arith.constant 82 : index
    %82 = memref.load %arg1[%c82] : memref<98xf32, #tpu.memory_space<smem>>
    %c83 = arith.constant 83 : index
    %83 = memref.load %arg1[%c83] : memref<98xf32, #tpu.memory_space<smem>>
    %c84 = arith.constant 84 : index
    %84 = memref.load %arg1[%c84] : memref<98xf32, #tpu.memory_space<smem>>
    %c85 = arith.constant 85 : index
    %85 = memref.load %arg1[%c85] : memref<98xf32, #tpu.memory_space<smem>>
    %c86 = arith.constant 86 : index
    %86 = memref.load %arg1[%c86] : memref<98xf32, #tpu.memory_space<smem>>
    %c87 = arith.constant 87 : index
    %87 = memref.load %arg1[%c87] : memref<98xf32, #tpu.memory_space<smem>>
    %c88 = arith.constant 88 : index
    %88 = memref.load %arg1[%c88] : memref<98xf32, #tpu.memory_space<smem>>
    %c89 = arith.constant 89 : index
    %89 = memref.load %arg1[%c89] : memref<98xf32, #tpu.memory_space<smem>>
    %c90 = arith.constant 90 : index
    %90 = memref.load %arg1[%c90] : memref<98xf32, #tpu.memory_space<smem>>
    %c91 = arith.constant 91 : index
    %91 = memref.load %arg1[%c91] : memref<98xf32, #tpu.memory_space<smem>>
    %c92 = arith.constant 92 : index
    %92 = memref.load %arg1[%c92] : memref<98xf32, #tpu.memory_space<smem>>
    %c93 = arith.constant 93 : index
    %93 = memref.load %arg1[%c93] : memref<98xf32, #tpu.memory_space<smem>>
    %c94 = arith.constant 94 : index
    %94 = memref.load %arg1[%c94] : memref<98xf32, #tpu.memory_space<smem>>
    %c95 = arith.constant 95 : index
    %95 = memref.load %arg1[%c95] : memref<98xf32, #tpu.memory_space<smem>>
    %c96 = arith.constant 96 : index
    %96 = memref.load %arg1[%c96] : memref<98xf32, #tpu.memory_space<smem>>
    %c97 = arith.constant 97 : index
    %97 = memref.load %arg1[%c97] : memref<98xf32, #tpu.memory_space<smem>>
    %c0_0 = arith.constant 0 : index
    %98 = memref.load %arg2[%c0_0] : memref<1xf32, #tpu.memory_space<smem>>
    %c0_1 = arith.constant 0 : index
    %c0_2 = arith.constant 0 : index
    %c0_3 = arith.constant 0 : index
    %99 = vector.load %arg5[%c0_1, %c0_2, %c0_3] : memref<1x4x256xf32, #tpu.memory_space<vmem>>, vector<1x4x256xf32>
    %100 = vector.shape_cast %99 : vector<1x4x256xf32> to vector<4x256xf32>
    %cst = arith.constant dense<0.000000e+00> : vector<256xf32>
    %101 = vector.multi_reduction <add>, %100, %cst [0] : vector<4x256xf32> to vector<256xf32>
    %102 = vector.shape_cast %101 : vector<256xf32> to vector<1x256xf32>
    %cst_4 = arith.constant 2.500000e-01 : f32
    %103 = vector.broadcast %cst_4 : f32 to vector<1x256xf32>
    %104 = arith.mulf %102, %103 : vector<1x256xf32>
    %cst_5 = arith.constant dense<0xFF800000> : vector<256xf32>
    %105 = vector.multi_reduction <maximumf>, %100, %cst_5 [0] : vector<4x256xf32> to vector<256xf32>
    %106 = vector.shape_cast %105 : vector<256xf32> to vector<1x256xf32>
    %c0_6 = arith.constant 0 : index
    %c0_7 = arith.constant 0 : index
    %107 = vector.load %arg4[%c0_6, %c0_7] : memref<7x256xf32, #tpu.memory_space<vmem>>, vector<1x256xf32>
    %108 = vector.shape_cast %107 : vector<1x256xf32> to vector<256xf32>
    %c3_i32 = arith.constant 3 : i32
    %109 = tpu.dynamic_rotate %104 by %c3_i32 dim 1 : vector<1x256xf32>, i32 -> vector<1x256xf32>
    %c3_i32_8 = arith.constant 3 : i32
    %110 = tpu.dynamic_rotate %106 by %c3_i32_8 dim 1 : vector<1x256xf32>, i32 -> vector<1x256xf32>
    %111 = vector.shape_cast %108 : vector<256xf32> to vector<1x256xf32>
    %112 = arith.mulf %109, %111 : vector<1x256xf32>
    %113 = vector.shape_cast %108 : vector<256xf32> to vector<1x256xf32>
    %114 = arith.mulf %110, %113 : vector<1x256xf32>
    %c1_9 = arith.constant 1 : index
    %c0_10 = arith.constant 0 : index
    %115 = vector.load %arg4[%c1_9, %c0_10] : memref<7x256xf32, #tpu.memory_space<vmem>>, vector<1x256xf32>
    %116 = vector.shape_cast %115 : vector<1x256xf32> to vector<256xf32>
    %c2_i32 = arith.constant 2 : i32
    %117 = tpu.dynamic_rotate %104 by %c2_i32 dim 1 : vector<1x256xf32>, i32 -> vector<1x256xf32>
    %c2_i32_11 = arith.constant 2 : i32
    %118 = tpu.dynamic_rotate %106 by %c2_i32_11 dim 1 : vector<1x256xf32>, i32 -> vector<1x256xf32>
    %119 = vector.shape_cast %116 : vector<256xf32> to vector<1x256xf32>
    %120 = arith.mulf %117, %119 : vector<1x256xf32>
    %121 = vector.shape_cast %116 : vector<256xf32> to vector<1x256xf32>
    %122 = arith.mulf %118, %121 : vector<1x256xf32>
    %c2_12 = arith.constant 2 : index
    %c0_13 = arith.constant 0 : index
    %123 = vector.load %arg4[%c2_12, %c0_13] : memref<7x256xf32, #tpu.memory_space<vmem>>, vector<1x256xf32>
    %124 = vector.shape_cast %123 : vector<1x256xf32> to vector<256xf32>
    %c1_i32 = arith.constant 1 : i32
    %125 = tpu.dynamic_rotate %104 by %c1_i32 dim 1 : vector<1x256xf32>, i32 -> vector<1x256xf32>
    %c1_i32_14 = arith.constant 1 : i32
    %126 = tpu.dynamic_rotate %106 by %c1_i32_14 dim 1 : vector<1x256xf32>, i32 -> vector<1x256xf32>
    %127 = vector.shape_cast %124 : vector<256xf32> to vector<1x256xf32>
    %128 = arith.mulf %125, %127 : vector<1x256xf32>
    %129 = vector.shape_cast %124 : vector<256xf32> to vector<1x256xf32>
    %130 = arith.mulf %126, %129 : vector<1x256xf32>
    %c3_15 = arith.constant 3 : index
    %c0_16 = arith.constant 0 : index
    %131 = vector.load %arg4[%c3_15, %c0_16] : memref<7x256xf32, #tpu.memory_space<vmem>>, vector<1x256xf32>
    %132 = vector.shape_cast %131 : vector<1x256xf32> to vector<256xf32>
    %133 = vector.shape_cast %132 : vector<256xf32> to vector<1x256xf32>
    %134 = arith.mulf %104, %133 : vector<1x256xf32>
    %135 = vector.shape_cast %132 : vector<256xf32> to vector<1x256xf32>
    %136 = arith.mulf %106, %135 : vector<1x256xf32>
    %c4_17 = arith.constant 4 : index
    %c0_18 = arith.constant 0 : index
    %137 = vector.load %arg4[%c4_17, %c0_18] : memref<7x256xf32, #tpu.memory_space<vmem>>, vector<1x256xf32>
    %138 = vector.shape_cast %137 : vector<1x256xf32> to vector<256xf32>
    %c255_i32 = arith.constant 255 : i32
    %139 = tpu.dynamic_rotate %104 by %c255_i32 dim 1 : vector<1x256xf32>, i32 -> vector<1x256xf32>
    %c255_i32_19 = arith.constant 255 : i32
    %140 = tpu.dynamic_rotate %106 by %c255_i32_19 dim 1 : vector<1x256xf32>, i32 -> vector<1x256xf32>
    %141 = vector.shape_cast %138 : vector<256xf32> to vector<1x256xf32>
    %142 = arith.mulf %139, %141 : vector<1x256xf32>
    %143 = vector.shape_cast %138 : vector<256xf32> to vector<1x256xf32>
    %144 = arith.mulf %140, %143 : vector<1x256xf32>
    %c5_20 = arith.constant 5 : index
    %c0_21 = arith.constant 0 : index
    %145 = vector.load %arg4[%c5_20, %c0_21] : memref<7x256xf32, #tpu.memory_space<vmem>>, vector<1x256xf32>
    %146 = vector.shape_cast %145 : vector<1x256xf32> to vector<256xf32>
    %c254_i32 = arith.constant 254 : i32
    %147 = tpu.dynamic_rotate %104 by %c254_i32 dim 1 : vector<1x256xf32>, i32 -> vector<1x256xf32>
    %c254_i32_22 = arith.constant 254 : i32
    %148 = tpu.dynamic_rotate %106 by %c254_i32_22 dim 1 : vector<1x256xf32>, i32 -> vector<1x256xf32>
    %149 = vector.shape_cast %146 : vector<256xf32> to vector<1x256xf32>
    %150 = arith.mulf %147, %149 : vector<1x256xf32>
    %151 = vector.shape_cast %146 : vector<256xf32> to vector<1x256xf32>
    %152 = arith.mulf %148, %151 : vector<1x256xf32>
    %c6_23 = arith.constant 6 : index
    %c0_24 = arith.constant 0 : index
    %153 = vector.load %arg4[%c6_23, %c0_24] : memref<7x256xf32, #tpu.memory_space<vmem>>, vector<1x256xf32>
    %154 = vector.shape_cast %153 : vector<1x256xf32> to vector<256xf32>
    %c253_i32 = arith.constant 253 : i32
    %155 = tpu.dynamic_rotate %104 by %c253_i32 dim 1 : vector<1x256xf32>, i32 -> vector<1x256xf32>
    %c253_i32_25 = arith.constant 253 : i32
    %156 = tpu.dynamic_rotate %106 by %c253_i32_25 dim 1 : vector<1x256xf32>, i32 -> vector<1x256xf32>
    %157 = vector.shape_cast %154 : vector<256xf32> to vector<1x256xf32>
    %158 = arith.mulf %155, %157 : vector<1x256xf32>
    %159 = vector.shape_cast %154 : vector<256xf32> to vector<1x256xf32>
    %160 = arith.mulf %156, %159 : vector<1x256xf32>
    %cst_26 = arith.constant 0.000000e+00 : f32
    %161 = vector.broadcast %cst_26 : f32 to vector<1x256xf32>
    %cst_27 = arith.constant 0.000000e+00 : f32
    %162 = vector.broadcast %cst_27 : f32 to vector<1x256xf32>
    %163 = vector.broadcast %0 : f32 to vector<1x256xf32>
    %164 = arith.mulf %112, %163 : vector<1x256xf32>
    %165 = vector.broadcast %49 : f32 to vector<1x256xf32>
    %166 = arith.mulf %114, %165 : vector<1x256xf32>
    %167 = arith.addf %164, %166 : vector<1x256xf32>
    %168 = vector.broadcast %1 : f32 to vector<1x256xf32>
    %169 = arith.mulf %120, %168 : vector<1x256xf32>
    %170 = vector.broadcast %50 : f32 to vector<1x256xf32>
    %171 = arith.mulf %122, %170 : vector<1x256xf32>
    %172 = arith.addf %169, %171 : vector<1x256xf32>
    %173 = vector.broadcast %2 : f32 to vector<1x256xf32>
    %174 = arith.mulf %128, %173 : vector<1x256xf32>
    %175 = vector.broadcast %51 : f32 to vector<1x256xf32>
    %176 = arith.mulf %130, %175 : vector<1x256xf32>
    %177 = arith.addf %174, %176 : vector<1x256xf32>
    %178 = arith.addf %167, %177 : vector<1x256xf32>
    %179 = vector.broadcast %3 : f32 to vector<1x256xf32>
    %180 = arith.mulf %134, %179 : vector<1x256xf32>
    %181 = vector.broadcast %52 : f32 to vector<1x256xf32>
    %182 = arith.mulf %136, %181 : vector<1x256xf32>
    %183 = arith.addf %180, %182 : vector<1x256xf32>
    %184 = arith.addf %172, %183 : vector<1x256xf32>
    %185 = vector.broadcast %4 : f32 to vector<1x256xf32>
    %186 = arith.mulf %142, %185 : vector<1x256xf32>
    %187 = vector.broadcast %53 : f32 to vector<1x256xf32>
    %188 = arith.mulf %144, %187 : vector<1x256xf32>
    %189 = arith.addf %186, %188 : vector<1x256xf32>
    %190 = arith.addf %178, %189 : vector<1x256xf32>
    %191 = vector.broadcast %5 : f32 to vector<1x256xf32>
    %192 = arith.mulf %150, %191 : vector<1x256xf32>
    %193 = vector.broadcast %54 : f32 to vector<1x256xf32>
    %194 = arith.mulf %152, %193 : vector<1x256xf32>
    %195 = arith.addf %192, %194 : vector<1x256xf32>
    %196 = arith.addf %184, %195 : vector<1x256xf32>
    %197 = vector.broadcast %6 : f32 to vector<1x256xf32>
    %198 = arith.mulf %158, %197 : vector<1x256xf32>
    %199 = vector.broadcast %55 : f32 to vector<1x256xf32>
    %200 = arith.mulf %160, %199 : vector<1x256xf32>
    %201 = arith.addf %198, %200 : vector<1x256xf32>
    %202 = arith.addf %190, %201 : vector<1x256xf32>
    %203 = arith.addf %202, %196 : vector<1x256xf32>
    %c48_i32 = arith.constant 48 : i32
    %204 = tpu.dynamic_rotate %203 by %c48_i32 dim 1 : vector<1x256xf32>, i32 -> vector<1x256xf32>
    %c0_28 = arith.constant 0 : index
    %c0_29 = arith.constant 0 : index
    %205 = vector.load %arg3[%c0_28, %c0_29] : memref<7x256xf32, #tpu.memory_space<vmem>>, vector<1x256xf32>
    %206 = vector.shape_cast %205 : vector<1x256xf32> to vector<256xf32>
    %207 = vector.shape_cast %206 : vector<256xf32> to vector<1x256xf32>
    %208 = arith.mulf %207, %204 : vector<1x256xf32>
    %209 = arith.addf %161, %208 : vector<1x256xf32>
    %210 = vector.broadcast %7 : f32 to vector<1x256xf32>
    %211 = arith.mulf %112, %210 : vector<1x256xf32>
    %212 = vector.broadcast %56 : f32 to vector<1x256xf32>
    %213 = arith.mulf %114, %212 : vector<1x256xf32>
    %214 = arith.addf %211, %213 : vector<1x256xf32>
    %215 = vector.broadcast %8 : f32 to vector<1x256xf32>
    %216 = arith.mulf %120, %215 : vector<1x256xf32>
    %217 = vector.broadcast %57 : f32 to vector<1x256xf32>
    %218 = arith.mulf %122, %217 : vector<1x256xf32>
    %219 = arith.addf %216, %218 : vector<1x256xf32>
    %220 = vector.broadcast %9 : f32 to vector<1x256xf32>
    %221 = arith.mulf %128, %220 : vector<1x256xf32>
    %222 = vector.broadcast %58 : f32 to vector<1x256xf32>
    %223 = arith.mulf %130, %222 : vector<1x256xf32>
    %224 = arith.addf %221, %223 : vector<1x256xf32>
    %225 = arith.addf %214, %224 : vector<1x256xf32>
    %226 = vector.broadcast %10 : f32 to vector<1x256xf32>
    %227 = arith.mulf %134, %226 : vector<1x256xf32>
    %228 = vector.broadcast %59 : f32 to vector<1x256xf32>
    %229 = arith.mulf %136, %228 : vector<1x256xf32>
    %230 = arith.addf %227, %229 : vector<1x256xf32>
    %231 = arith.addf %219, %230 : vector<1x256xf32>
    %232 = vector.broadcast %11 : f32 to vector<1x256xf32>
    %233 = arith.mulf %142, %232 : vector<1x256xf32>
    %234 = vector.broadcast %60 : f32 to vector<1x256xf32>
    %235 = arith.mulf %144, %234 : vector<1x256xf32>
    %236 = arith.addf %233, %235 : vector<1x256xf32>
    %237 = arith.addf %225, %236 : vector<1x256xf32>
    %238 = vector.broadcast %12 : f32 to vector<1x256xf32>
    %239 = arith.mulf %150, %238 : vector<1x256xf32>
    %240 = vector.broadcast %61 : f32 to vector<1x256xf32>
    %241 = arith.mulf %152, %240 : vector<1x256xf32>
    %242 = arith.addf %239, %241 : vector<1x256xf32>
    %243 = arith.addf %231, %242 : vector<1x256xf32>
    %244 = vector.broadcast %13 : f32 to vector<1x256xf32>
    %245 = arith.mulf %158, %244 : vector<1x256xf32>
    %246 = vector.broadcast %62 : f32 to vector<1x256xf32>
    %247 = arith.mulf %160, %246 : vector<1x256xf32>
    %248 = arith.addf %245, %247 : vector<1x256xf32>
    %249 = arith.addf %237, %248 : vector<1x256xf32>
    %250 = arith.addf %249, %243 : vector<1x256xf32>
    %c32_i32 = arith.constant 32 : i32
    %251 = tpu.dynamic_rotate %250 by %c32_i32 dim 1 : vector<1x256xf32>, i32 -> vector<1x256xf32>
    %c1_30 = arith.constant 1 : index
    %c0_31 = arith.constant 0 : index
    %252 = vector.load %arg3[%c1_30, %c0_31] : memref<7x256xf32, #tpu.memory_space<vmem>>, vector<1x256xf32>
    %253 = vector.shape_cast %252 : vector<1x256xf32> to vector<256xf32>
    %254 = vector.shape_cast %253 : vector<256xf32> to vector<1x256xf32>
    %255 = arith.mulf %254, %251 : vector<1x256xf32>
    %256 = arith.addf %162, %255 : vector<1x256xf32>
    %257 = vector.broadcast %14 : f32 to vector<1x256xf32>
    %258 = arith.mulf %112, %257 : vector<1x256xf32>
    %259 = vector.broadcast %63 : f32 to vector<1x256xf32>
    %260 = arith.mulf %114, %259 : vector<1x256xf32>
    %261 = arith.addf %258, %260 : vector<1x256xf32>
    %262 = vector.broadcast %15 : f32 to vector<1x256xf32>
    %263 = arith.mulf %120, %262 : vector<1x256xf32>
    %264 = vector.broadcast %64 : f32 to vector<1x256xf32>
    %265 = arith.mulf %122, %264 : vector<1x256xf32>
    %266 = arith.addf %263, %265 : vector<1x256xf32>
    %267 = vector.broadcast %16 : f32 to vector<1x256xf32>
    %268 = arith.mulf %128, %267 : vector<1x256xf32>
    %269 = vector.broadcast %65 : f32 to vector<1x256xf32>
    %270 = arith.mulf %130, %269 : vector<1x256xf32>
    %271 = arith.addf %268, %270 : vector<1x256xf32>
    %272 = arith.addf %261, %271 : vector<1x256xf32>
    %273 = vector.broadcast %17 : f32 to vector<1x256xf32>
    %274 = arith.mulf %134, %273 : vector<1x256xf32>
    %275 = vector.broadcast %66 : f32 to vector<1x256xf32>
    %276 = arith.mulf %136, %275 : vector<1x256xf32>
    %277 = arith.addf %274, %276 : vector<1x256xf32>
    %278 = arith.addf %266, %277 : vector<1x256xf32>
    %279 = vector.broadcast %18 : f32 to vector<1x256xf32>
    %280 = arith.mulf %142, %279 : vector<1x256xf32>
    %281 = vector.broadcast %67 : f32 to vector<1x256xf32>
    %282 = arith.mulf %144, %281 : vector<1x256xf32>
    %283 = arith.addf %280, %282 : vector<1x256xf32>
    %284 = arith.addf %272, %283 : vector<1x256xf32>
    %285 = vector.broadcast %19 : f32 to vector<1x256xf32>
    %286 = arith.mulf %150, %285 : vector<1x256xf32>
    %287 = vector.broadcast %68 : f32 to vector<1x256xf32>
    %288 = arith.mulf %152, %287 : vector<1x256xf32>
    %289 = arith.addf %286, %288 : vector<1x256xf32>
    %290 = arith.addf %278, %289 : vector<1x256xf32>
    %291 = vector.broadcast %20 : f32 to vector<1x256xf32>
    %292 = arith.mulf %158, %291 : vector<1x256xf32>
    %293 = vector.broadcast %69 : f32 to vector<1x256xf32>
    %294 = arith.mulf %160, %293 : vector<1x256xf32>
    %295 = arith.addf %292, %294 : vector<1x256xf32>
    %296 = arith.addf %284, %295 : vector<1x256xf32>
    %297 = arith.addf %296, %290 : vector<1x256xf32>
    %c16_i32 = arith.constant 16 : i32
    %298 = tpu.dynamic_rotate %297 by %c16_i32 dim 1 : vector<1x256xf32>, i32 -> vector<1x256xf32>
    %c2_32 = arith.constant 2 : index
    %c0_33 = arith.constant 0 : index
    %299 = vector.load %arg3[%c2_32, %c0_33] : memref<7x256xf32, #tpu.memory_space<vmem>>, vector<1x256xf32>
    %300 = vector.shape_cast %299 : vector<1x256xf32> to vector<256xf32>
    %301 = vector.shape_cast %300 : vector<256xf32> to vector<1x256xf32>
    %302 = arith.mulf %301, %298 : vector<1x256xf32>
    %303 = arith.addf %209, %302 : vector<1x256xf32>
    %304 = vector.broadcast %21 : f32 to vector<1x256xf32>
    %305 = arith.mulf %112, %304 : vector<1x256xf32>
    %306 = vector.broadcast %70 : f32 to vector<1x256xf32>
    %307 = arith.mulf %114, %306 : vector<1x256xf32>
    %308 = arith.addf %305, %307 : vector<1x256xf32>
    %309 = vector.broadcast %22 : f32 to vector<1x256xf32>
    %310 = arith.mulf %120, %309 : vector<1x256xf32>
    %311 = vector.broadcast %71 : f32 to vector<1x256xf32>
    %312 = arith.mulf %122, %311 : vector<1x256xf32>
    %313 = arith.addf %310, %312 : vector<1x256xf32>
    %314 = vector.broadcast %23 : f32 to vector<1x256xf32>
    %315 = arith.mulf %128, %314 : vector<1x256xf32>
    %316 = vector.broadcast %72 : f32 to vector<1x256xf32>
    %317 = arith.mulf %130, %316 : vector<1x256xf32>
    %318 = arith.addf %315, %317 : vector<1x256xf32>
    %319 = arith.addf %308, %318 : vector<1x256xf32>
    %320 = vector.broadcast %24 : f32 to vector<1x256xf32>
    %321 = arith.mulf %134, %320 : vector<1x256xf32>
    %322 = vector.broadcast %73 : f32 to vector<1x256xf32>
    %323 = arith.mulf %136, %322 : vector<1x256xf32>
    %324 = arith.addf %321, %323 : vector<1x256xf32>
    %325 = arith.addf %313, %324 : vector<1x256xf32>
    %326 = vector.broadcast %25 : f32 to vector<1x256xf32>
    %327 = arith.mulf %142, %326 : vector<1x256xf32>
    %328 = vector.broadcast %74 : f32 to vector<1x256xf32>
    %329 = arith.mulf %144, %328 : vector<1x256xf32>
    %330 = arith.addf %327, %329 : vector<1x256xf32>
    %331 = arith.addf %319, %330 : vector<1x256xf32>
    %332 = vector.broadcast %26 : f32 to vector<1x256xf32>
    %333 = arith.mulf %150, %332 : vector<1x256xf32>
    %334 = vector.broadcast %75 : f32 to vector<1x256xf32>
    %335 = arith.mulf %152, %334 : vector<1x256xf32>
    %336 = arith.addf %333, %335 : vector<1x256xf32>
    %337 = arith.addf %325, %336 : vector<1x256xf32>
    %338 = vector.broadcast %27 : f32 to vector<1x256xf32>
    %339 = arith.mulf %158, %338 : vector<1x256xf32>
    %340 = vector.broadcast %76 : f32 to vector<1x256xf32>
    %341 = arith.mulf %160, %340 : vector<1x256xf32>
    %342 = arith.addf %339, %341 : vector<1x256xf32>
    %343 = arith.addf %331, %342 : vector<1x256xf32>
    %344 = arith.addf %343, %337 : vector<1x256xf32>
    %c3_34 = arith.constant 3 : index
    %c0_35 = arith.constant 0 : index
    %345 = vector.load %arg3[%c3_34, %c0_35] : memref<7x256xf32, #tpu.memory_space<vmem>>, vector<1x256xf32>
    %346 = vector.shape_cast %345 : vector<1x256xf32> to vector<256xf32>
    %347 = vector.shape_cast %346 : vector<256xf32> to vector<1x256xf32>
    %348 = arith.mulf %347, %344 : vector<1x256xf32>
    %349 = arith.addf %256, %348 : vector<1x256xf32>
    %350 = vector.broadcast %28 : f32 to vector<1x256xf32>
    %351 = arith.mulf %112, %350 : vector<1x256xf32>
    %352 = vector.broadcast %77 : f32 to vector<1x256xf32>
    %353 = arith.mulf %114, %352 : vector<1x256xf32>
    %354 = arith.addf %351, %353 : vector<1x256xf32>
    %355 = vector.broadcast %29 : f32 to vector<1x256xf32>
    %356 = arith.mulf %120, %355 : vector<1x256xf32>
    %357 = vector.broadcast %78 : f32 to vector<1x256xf32>
    %358 = arith.mulf %122, %357 : vector<1x256xf32>
    %359 = arith.addf %356, %358 : vector<1x256xf32>
    %360 = vector.broadcast %30 : f32 to vector<1x256xf32>
    %361 = arith.mulf %128, %360 : vector<1x256xf32>
    %362 = vector.broadcast %79 : f32 to vector<1x256xf32>
    %363 = arith.mulf %130, %362 : vector<1x256xf32>
    %364 = arith.addf %361, %363 : vector<1x256xf32>
    %365 = arith.addf %354, %364 : vector<1x256xf32>
    %366 = vector.broadcast %31 : f32 to vector<1x256xf32>
    %367 = arith.mulf %134, %366 : vector<1x256xf32>
    %368 = vector.broadcast %80 : f32 to vector<1x256xf32>
    %369 = arith.mulf %136, %368 : vector<1x256xf32>
    %370 = arith.addf %367, %369 : vector<1x256xf32>
    %371 = arith.addf %359, %370 : vector<1x256xf32>
    %372 = vector.broadcast %32 : f32 to vector<1x256xf32>
    %373 = arith.mulf %142, %372 : vector<1x256xf32>
    %374 = vector.broadcast %81 : f32 to vector<1x256xf32>
    %375 = arith.mulf %144, %374 : vector<1x256xf32>
    %376 = arith.addf %373, %375 : vector<1x256xf32>
    %377 = arith.addf %365, %376 : vector<1x256xf32>
    %378 = vector.broadcast %33 : f32 to vector<1x256xf32>
    %379 = arith.mulf %150, %378 : vector<1x256xf32>
    %380 = vector.broadcast %82 : f32 to vector<1x256xf32>
    %381 = arith.mulf %152, %380 : vector<1x256xf32>
    %382 = arith.addf %379, %381 : vector<1x256xf32>
    %383 = arith.addf %371, %382 : vector<1x256xf32>
    %384 = vector.broadcast %34 : f32 to vector<1x256xf32>
    %385 = arith.mulf %158, %384 : vector<1x256xf32>
    %386 = vector.broadcast %83 : f32 to vector<1x256xf32>
    %387 = arith.mulf %160, %386 : vector<1x256xf32>
    %388 = arith.addf %385, %387 : vector<1x256xf32>
    %389 = arith.addf %377, %388 : vector<1x256xf32>
    %390 = arith.addf %389, %383 : vector<1x256xf32>
    %c240_i32 = arith.constant 240 : i32
    %391 = tpu.dynamic_rotate %390 by %c240_i32 dim 1 : vector<1x256xf32>, i32 -> vector<1x256xf32>
    %c4_36 = arith.constant 4 : index
    %c0_37 = arith.constant 0 : index
    %392 = vector.load %arg3[%c4_36, %c0_37] : memref<7x256xf32, #tpu.memory_space<vmem>>, vector<1x256xf32>
    %393 = vector.shape_cast %392 : vector<1x256xf32> to vector<256xf32>
    %394 = vector.shape_cast %393 : vector<256xf32> to vector<1x256xf32>
    %395 = arith.mulf %394, %391 : vector<1x256xf32>
    %396 = arith.addf %303, %395 : vector<1x256xf32>
    %397 = vector.broadcast %35 : f32 to vector<1x256xf32>
    %398 = arith.mulf %112, %397 : vector<1x256xf32>
    %399 = vector.broadcast %84 : f32 to vector<1x256xf32>
    %400 = arith.mulf %114, %399 : vector<1x256xf32>
    %401 = arith.addf %398, %400 : vector<1x256xf32>
    %402 = vector.broadcast %36 : f32 to vector<1x256xf32>
    %403 = arith.mulf %120, %402 : vector<1x256xf32>
    %404 = vector.broadcast %85 : f32 to vector<1x256xf32>
    %405 = arith.mulf %122, %404 : vector<1x256xf32>
    %406 = arith.addf %403, %405 : vector<1x256xf32>
    %407 = vector.broadcast %37 : f32 to vector<1x256xf32>
    %408 = arith.mulf %128, %407 : vector<1x256xf32>
    %409 = vector.broadcast %86 : f32 to vector<1x256xf32>
    %410 = arith.mulf %130, %409 : vector<1x256xf32>
    %411 = arith.addf %408, %410 : vector<1x256xf32>
    %412 = arith.addf %401, %411 : vector<1x256xf32>
    %413 = vector.broadcast %38 : f32 to vector<1x256xf32>
    %414 = arith.mulf %134, %413 : vector<1x256xf32>
    %415 = vector.broadcast %87 : f32 to vector<1x256xf32>
    %416 = arith.mulf %136, %415 : vector<1x256xf32>
    %417 = arith.addf %414, %416 : vector<1x256xf32>
    %418 = arith.addf %406, %417 : vector<1x256xf32>
    %419 = vector.broadcast %39 : f32 to vector<1x256xf32>
    %420 = arith.mulf %142, %419 : vector<1x256xf32>
    %421 = vector.broadcast %88 : f32 to vector<1x256xf32>
    %422 = arith.mulf %144, %421 : vector<1x256xf32>
    %423 = arith.addf %420, %422 : vector<1x256xf32>
    %424 = arith.addf %412, %423 : vector<1x256xf32>
    %425 = vector.broadcast %40 : f32 to vector<1x256xf32>
    %426 = arith.mulf %150, %425 : vector<1x256xf32>
    %427 = vector.broadcast %89 : f32 to vector<1x256xf32>
    %428 = arith.mulf %152, %427 : vector<1x256xf32>
    %429 = arith.addf %426, %428 : vector<1x256xf32>
    %430 = arith.addf %418, %429 : vector<1x256xf32>
    %431 = vector.broadcast %41 : f32 to vector<1x256xf32>
    %432 = arith.mulf %158, %431 : vector<1x256xf32>
    %433 = vector.broadcast %90 : f32 to vector<1x256xf32>
    %434 = arith.mulf %160, %433 : vector<1x256xf32>
    %435 = arith.addf %432, %434 : vector<1x256xf32>
    %436 = arith.addf %424, %435 : vector<1x256xf32>
    %437 = arith.addf %436, %430 : vector<1x256xf32>
    %c224_i32 = arith.constant 224 : i32
    %438 = tpu.dynamic_rotate %437 by %c224_i32 dim 1 : vector<1x256xf32>, i32 -> vector<1x256xf32>
    %c5_38 = arith.constant 5 : index
    %c0_39 = arith.constant 0 : index
    %439 = vector.load %arg3[%c5_38, %c0_39] : memref<7x256xf32, #tpu.memory_space<vmem>>, vector<1x256xf32>
    %440 = vector.shape_cast %439 : vector<1x256xf32> to vector<256xf32>
    %441 = vector.shape_cast %440 : vector<256xf32> to vector<1x256xf32>
    %442 = arith.mulf %441, %438 : vector<1x256xf32>
    %443 = arith.addf %349, %442 : vector<1x256xf32>
    %444 = vector.broadcast %42 : f32 to vector<1x256xf32>
    %445 = arith.mulf %112, %444 : vector<1x256xf32>
    %446 = vector.broadcast %91 : f32 to vector<1x256xf32>
    %447 = arith.mulf %114, %446 : vector<1x256xf32>
    %448 = arith.addf %445, %447 : vector<1x256xf32>
    %449 = vector.broadcast %43 : f32 to vector<1x256xf32>
    %450 = arith.mulf %120, %449 : vector<1x256xf32>
    %451 = vector.broadcast %92 : f32 to vector<1x256xf32>
    %452 = arith.mulf %122, %451 : vector<1x256xf32>
    %453 = arith.addf %450, %452 : vector<1x256xf32>
    %454 = vector.broadcast %44 : f32 to vector<1x256xf32>
    %455 = arith.mulf %128, %454 : vector<1x256xf32>
    %456 = vector.broadcast %93 : f32 to vector<1x256xf32>
    %457 = arith.mulf %130, %456 : vector<1x256xf32>
    %458 = arith.addf %455, %457 : vector<1x256xf32>
    %459 = arith.addf %448, %458 : vector<1x256xf32>
    %460 = vector.broadcast %45 : f32 to vector<1x256xf32>
    %461 = arith.mulf %134, %460 : vector<1x256xf32>
    %462 = vector.broadcast %94 : f32 to vector<1x256xf32>
    %463 = arith.mulf %136, %462 : vector<1x256xf32>
    %464 = arith.addf %461, %463 : vector<1x256xf32>
    %465 = arith.addf %453, %464 : vector<1x256xf32>
    %466 = vector.broadcast %46 : f32 to vector<1x256xf32>
    %467 = arith.mulf %142, %466 : vector<1x256xf32>
    %468 = vector.broadcast %95 : f32 to vector<1x256xf32>
    %469 = arith.mulf %144, %468 : vector<1x256xf32>
    %470 = arith.addf %467, %469 : vector<1x256xf32>
    %471 = arith.addf %459, %470 : vector<1x256xf32>
    %472 = vector.broadcast %47 : f32 to vector<1x256xf32>
    %473 = arith.mulf %150, %472 : vector<1x256xf32>
    %474 = vector.broadcast %96 : f32 to vector<1x256xf32>
    %475 = arith.mulf %152, %474 : vector<1x256xf32>
    %476 = arith.addf %473, %475 : vector<1x256xf32>
    %477 = arith.addf %465, %476 : vector<1x256xf32>
    %478 = vector.broadcast %48 : f32 to vector<1x256xf32>
    %479 = arith.mulf %158, %478 : vector<1x256xf32>
    %480 = vector.broadcast %97 : f32 to vector<1x256xf32>
    %481 = arith.mulf %160, %480 : vector<1x256xf32>
    %482 = arith.addf %479, %481 : vector<1x256xf32>
    %483 = arith.addf %471, %482 : vector<1x256xf32>
    %484 = arith.addf %483, %477 : vector<1x256xf32>
    %c208_i32 = arith.constant 208 : i32
    %485 = tpu.dynamic_rotate %484 by %c208_i32 dim 1 : vector<1x256xf32>, i32 -> vector<1x256xf32>
    %c6_40 = arith.constant 6 : index
    %c0_41 = arith.constant 0 : index
    %486 = vector.load %arg3[%c6_40, %c0_41] : memref<7x256xf32, #tpu.memory_space<vmem>>, vector<1x256xf32>
    %487 = vector.shape_cast %486 : vector<1x256xf32> to vector<256xf32>
    %488 = vector.shape_cast %487 : vector<256xf32> to vector<1x256xf32>
    %489 = arith.mulf %488, %485 : vector<1x256xf32>
    %490 = arith.addf %396, %489 : vector<1x256xf32>
    %491 = arith.addf %490, %443 : vector<1x256xf32>
    %492 = vector.broadcast %98 : f32 to vector<1x256xf32>
    %493 = arith.addf %491, %492 : vector<1x256xf32>
    %494 = arith.negf %493 : vector<1x256xf32>
    %495 = math.exp %494 : vector<1x256xf32>
    %cst_42 = arith.constant 1.000000e+00 : f32
    %496 = vector.broadcast %cst_42 : f32 to vector<1x256xf32>
    %497 = arith.addf %496, %495 : vector<1x256xf32>
    %498 = arith.divf %496, %497 : vector<1x256xf32>
    %c0_43 = arith.constant 0 : index
    %c0_44 = arith.constant 0 : index
    %c0_45 = arith.constant 0 : index
    %499 = vector.load %arg5[%c0_43, %c0_44, %c0_45] : memref<1x4x256xf32, #tpu.memory_space<vmem>>, vector<1x4x256xf32>
    %500 = vector.shape_cast %499 : vector<1x4x256xf32> to vector<4x256xf32>
    %501 = vector.broadcast %498 : vector<1x256xf32> to vector<4x256xf32>
    %502 = arith.mulf %500, %501 : vector<4x256xf32>
    %c0_46 = arith.constant 0 : index
    %c0_47 = arith.constant 0 : index
    %c0_48 = arith.constant 0 : index
    %503 = vector.load %arg6[%c0_46, %c0_47, %c0_48] : memref<1x4x256xf32, #tpu.memory_space<vmem>>, vector<1x4x256xf32>
    %504 = vector.shape_cast %503 : vector<1x4x256xf32> to vector<4x256xf32>
    %505 = vector.shape_cast %502 : vector<4x256xf32> to vector<1x4x256xf32>
    tpu.vector_store %arg6[%c0_46, %c0_47, %c0_48], %505 {strides = array<i32>} : memref<1x4x256xf32, #tpu.memory_space<vmem>>, vector<1x4x256xf32>,
    return
  }
  func.func @transform_0(%arg0: i32) -> i32 {
    %c0_i32 = arith.constant 0 : i32
    %c0_i32_0 = arith.constant 0 : i32
    return %c0_i32 : i32
  }
  func.func @transform_1(%arg0: i32) -> i32 {
    %c0_i32 = arith.constant 0 : i32
    %c0_i32_0 = arith.constant 0 : i32
    return %c0_i32 : i32
  }
  func.func @transform_2(%arg0: i32) -> (i32, i32) {
    %c0_i32 = arith.constant 0 : i32
    %c0_i32_0 = arith.constant 0 : i32
    %c0_i32_1 = arith.constant 0 : i32
    return %c0_i32, %c0_i32_0 : i32, i32
  }
  func.func @transform_3(%arg0: i32) -> (i32, i32) {
    %c0_i32 = arith.constant 0 : i32
    %c0_i32_0 = arith.constant 0 : i32
    %c0_i32_1 = arith.constant 0 : i32
    return %c0_i32, %c0_i32_0 : i32, i32
  }
  func.func @transform_4(%arg0: i32) -> (i32, i32, i32) {
    %c0_i32 = arith.constant 0 : i32
    %c0_i32_0 = arith.constant 0 : i32
    %c0_i32_1 = arith.constant 0 : i32
    return %arg0, %c0_i32, %c0_i32_0 : i32, i32, i32
  }
  func.func @transform_5(%arg0: i32) -> (i32, i32, i32) {
    %c0_i32 = arith.constant 0 : i32
    %c0_i32_0 = arith.constant 0 : i32
    %c0_i32_1 = arith.constant 0 : i32
    return %arg0, %c0_i32, %c0_i32_0 : i32, i32, i32
  }
}

</mosaic_0001>

<bundles_post_ra>
// kernel: tpu_custom_call.1
= control target key start
LH: loop header
LB: loop body
LE: loop exit
PB: predicated region body
PF: predicated region fallthrough
CT: control target
= control target key end

     0   :  { %s3062_s0 = inlined_call_operand.vmem [shape: f32[98], index: 0, kind: input, shape index: {}]   ;;  %s3063_s1 = inlined_call_operand.<no memory space> [shape: f32[1], index: 1, kind: input, shape index: {}]   ;;  %s3064_s2 = inlined_call_operand.hbm [shape: f32[7,256], index: 2, kind: input, shape index: {}]   ;;  %s3065_s3 = inlined_call_operand.hbm [shape: f32[7,256], index: 3, kind: input, shape index: {}]   ;;  %s3066_s4 = inlined_call_operand.hbm [shape: f32[2,4,256], index: 4, kind: input, shape index: {}]   ;;  %s3067_s5 = inlined_call_operand.hbm [shape: f32[2,4,256], index: 5, kind: output, shape index: {}]  }
   0x1   :  { %3130 = sst [smem:[#allocation49_spill]] %s3062_s0 }
   0x2   :  { %3131 = sst [smem:[#allocation50_spill]] %s3064_s2 }
   0x3   :  { %3132 = sst [smem:[#allocation51_spill]] %s3065_s3 }
   0x4   :  { %3133 = sst [smem:[#allocation52_spill]] %s3066_s4 }
   0x5   :  { %3134 = sst [smem:[#allocation53_spill]] %s3067_s5 }
   0x6   :  { %10 = sst [smem:[#allocation4]] %s3063_s1 }
   0x7   :  { %11 = vsyncpa [#allocation8], 0 }
   0x8   :  { %12 = vsyncpa [#allocation6], 0 }
   0x9   :  { %13 = vsyncpa [#allocation11], 0 }
   0xa   :  { %14 = vsyncpa [#allocation7], 0 }
   0xb   :  { %16 = vsyncpa [#allocation7 + $0x1], 0  ;;  %s1758_s20 = smov 0   ;;  %s1760_s21 = smov 0  }
   0xc   :  { %s1762_s22 = smov 0   ;;  %s1764_s23 = smov 0  }
   0xd LB: > { %3135 = sst [smem:[#allocation19_spill]] %s1696_s20  ;;  %s1779_s1 = sadd.s32 4294967295, %s1708_s23   ;;  %s1708_s23 = sphi %s1764_s23, %s3295_s23   ;;  %s1704_s22 = sphi %s1762_s22, %s3298_s22   ;;  %s1700_s21 = sphi %s1760_s21, %s3297_s21   ;;  %s1696_s20 = sphi %s1758_s20, %s3296_s20  }
   0xe   : > { %3136 = sst [smem:[#allocation20_spill]] %s1700_s21  ;;  %s1312_s24 = sadd.s32 4294967294, %s1708_s23  }
   0xf   : > { %3137 = sst [smem:[#allocation21_spill]] %s1704_s22  ;;  %p126_p0 = scmp.ne.s32.totalorder %s1700_s21, %s1696_s20 }
  0x10   : > { %3138 = sst [smem:[#allocation22_spill]] %s1708_s23  ;;  %p127_p1 = scmp.eq.s32.totalorder %s1779_s1, 0 }
  0x11   : > { %3139 = sst [smem:[#allocation23_spill]] %s1779_s1  ;;  %p150_p2 = scmp.eq.s32.totalorder %s1779_s1, 1 }
  0x12   : > { %p156_p3 = scmp.eq.s32.totalorder %s1312_s24, 1  ;;  %p1788_p4 = por %p127_p1, %p126_p0 }
  0x13   : > { %p1313_p5 = scmp.ge.s32.totalorder %s1708_s23, 1  ;;  %p163_p7 = scmp.lt.s32.totalorder %s1708_s23, 3 }
  0x14   : > { %p1793_p6 = por %p156_p3, %p126_p0  ;;  %s3143_s2 = sld [smem:[#allocation50_spill]] }
  0x15   : > { %p1801_p8 = pnand %p1313_p5, %p163_p7  ;;  %s1710_s6 = smov [#allocation9]  }
  0x16   : > { %s3141_s26 = scalar_select %p1793_p6, 1, 0 }
  0x17   : > { %p1448_p10 = pneg %p1801_p8  ;;  %s190_s7 = sshll.u32 %s1710_s6, 4  ;;  %s191_s7 = int_to_ptr.vmem [resolvable:$true] %s190_s7 }
  0x18   : > { %3142 = sst [smem:[#allocation24_spill]] %s3141_s26  ;;  %s1711_s14 = smov [#allocation5]  }
  0x19   : > { %s3145_s0 = sld [smem:[#allocation49_spill]]  ;;  %p1449_p11 = pnand %p1448_p10, %p127_p1 }
  0x1a   : > { %s188_s29 = sshll.u32 %s3143_s2, 4  ;;  %s3146_s3 = sld [smem:[#allocation51_spill]]  ;;  %s189_s29 = int_to_ptr.hbm [resolvable:$true] %s188_s29 }
  0x1b   : > { %1454 = dma.hbm_to_vmem [thread:$0]  (!%p1449_p11), %s189_s29, 256, %s191_s7, [#allocation6]  }
  0x1c   : > { %s1712_s15 = smov [#allocation10]   ;;  %s1817_s17 = sadd.s32 1, %s1708_s23  }
  0x1d   : > { %s202_s16 = sshll.u32 %s1712_s15, 4  ;;  %3147 = sst [smem:[#allocation25_spill]] %s1817_s17  ;;  %s203_s16 = int_to_ptr.vmem [resolvable:$true] %s202_s16 }
  0x1e   : > { %s110_s18 = ssub.s32 %s1708_s23, %s1817_s17  ;;  %s113_s19 = sadd.s32 1, %s1704_s22 }
  0x1f   : > { %s175_s10 = sshll.u32 %s3145_s0, 4  ;;  %p111_p12 = scmp.eq.s32.totalorder %s110_s18, 0  ;;  %s176_s10 = int_to_ptr.vmem [resolvable:$true] %s175_s10 }
  0x20   : > { %s200_s13 = sshll.u32 %s3146_s3, 4  ;;  %p120_p13 = scmp.ne.s32.totalorder %s1704_s22, %s1700_s21  ;;  %s201_s13 = int_to_ptr.hbm [resolvable:$true] %s200_s13 }
  0x21   : > { %1451 = dma.vmem_to_smem (!%p1449_p11), %s176_s10, 16, %s1711_s14, [#allocation8]  }
  0x22   : > { %1457 = dma.hbm_to_vmem [thread:$0]  (!%p1449_p11), %s201_s13, 256, %s203_s16, [#allocation11]  }
  0x23   : > { %p121_p0 = scmp.eq.s32.totalorder %s1708_s23, 0  ;;  %p1469_p3 = scmp.lt.s32.totalorder %s1708_s23, 2 }
  0x24   : > { %s1827_s24 = scalar_select %p111_p12, %s1704_s22, %s113_s19  }
  0x25   : > { %p122_p5 = por %p121_p0, %p120_p13  ;;  %p1831_p7 = por %p150_p2, %p120_p13 }
  0x26   : > { %3148 = sst [smem:[#allocation26_spill]] %s1827_s24  ;;  %s213_s28 = sand.u32 1, %s1708_s23  }
  0x27   : > { %s3149_s27 = scalar_select %p1831_p7, 1, 0 }
  0x28   : > { %s215_s29 = sand.u32 1, %s1704_s22   ;;  %s1430_s7 = sshll.u32 %s1708_s23, 3 }
  0x29   : > { %3150 = sst [smem:[#allocation27_spill]] %s3149_s27  ;;  %s1318_s6 = sshll.u32 %s215_s29, 3 }
  0x2a   : > { %s3151_s4 = sld [smem:[#allocation52_spill]]  ;;  %s217_s11 = scalar_lea.vmem [#allocation12], %s1318_s6 }
  0x2b   : > { %s226_s12 = sshll.u32 %s217_s11, 4  ;;  %p1843_p10 = pnand %p1469_p3, %p122_p5  ;;  %s227_s12 = int_to_ptr.vmem [resolvable:$true] %s226_s12 }
  0x2c   : > { %s214_s15 = scalar_lea.sflag [#allocation6], %s213_s28 }
  0x2d   : > { %p1604_p11 = pneg %p1843_p10 }
  0x30   : > { %s222_s10 = scalar_lea.hbm %s3151_s4, %s1430_s7  ;;  %s1607_s6 = scalar_lea.hbm %s3151_s4, 16 }
  0x31   : > { %s224_s13 = sshll.u32 %s222_s10, 4  ;;  %s225_s13 = int_to_ptr.hbm [resolvable:$true] %s224_s13 }
  0x32   : > { %s1600_s16 = sshra.s32 %s225_s13, 4  ;;  %s1601_s16 = int_to_ptr.hbm [resolvable:$true] %s1600_s16 }
  0x33   : > { %s1602_s18 = scalar_lea.hbm %s1601_s16, 8  ;;  %p1608_p0 = scmp.lt.s32.totalorder %s1601_s16, %s3151_s4 }
  0x34   : > { %p1603_p2 = scmp.ne.s32.totalorder %s1601_s16, %s1602_s18  ;;  %p1609_p3 = scmp.lt.s32.totalorder %s1607_s6, %s1602_s18 }
  0x36   : > { %p1605_p12 = pnand %p1604_p11, %p1603_p2  ;;  %p1610_p5 = por %p1609_p3, %p1608_p0 }
  0x38   : > { %p1606_p13 = pneg %p1605_p12 }
  0x3a   : > { %p1611_p9 = pnand %p1610_p5, %p1606_p13 }
  0x3c   : > { %1614 = shalt.err (!%p1611_p9)
}
  0x3d   : > { %1461 = dma.hbm_to_vmem [thread:$0]  (!%p1843_p10), %s225_s13, 128, %s227_s12, %s214_s15  }
  0x3e   : > { %235 = sbr.rel (%p1801_p8) target bundleno = 517 (0x205), region = 40 }
  0x43   : > { %1675 = dma.done.wait (%p127_p1), [#allocation8], 16  }
  0x44   : > { %1677 = vsyncadd (%p127_p1), [#allocation8], 4294967280 }
  0x45   : > { %1679 = dma.done.wait (%p127_p1), [#allocation6], 256  }
  0x46   : > { %1681 = vsyncadd (%p127_p1), [#allocation6], 4294967040 }
  0x47   : > { %1683 = dma.done.wait (%p127_p1), [#allocation11], 256  }
  0x48   : > { %1685 = vsyncadd (%p127_p1), [#allocation11], 4294967040  ;;  %s252_s30 = sand.u32 1, %s1779_s1   ;;  %s3068_s28 = sand.u32 1, %s1700_s21  }
  0x49   : > { %s1875_s9 = sshll.u32 %s3068_s28, 3  ;;  %s253_s10 = scalar_lea.sflag [#allocation6], %s252_s30 }
  0x4a   : > { %3153 = sst [smem:[#allocation28_spill]] %s1875_s9  ;;  %s256_s11 = scalar_lea.vmem [#allocation12], %s1875_s9 }
  0x4b   : > { %1687 = dma.done.wait (%p1788_p4), %s253_s10, 128  }
  0x4c   : > { %1689 = vsyncadd (%p1788_p4), %s253_s10, 4294967168 }
  0x4d   : > { %262 = sfence }
  0x4e   : > { %v1882_v0 = vld [vmem:[%s256_s11] sm:$0xff]  ;;  %vm391_vm0 = vcmask 1043456   ;;  %s1713_s25 = smov 3   ;;  %s1714_s12 = smov 1   ;;  %v432_v36 = vlaneseq  ;;  %vm662_vm12 = vcmask 1040384  }
  0x4f   : > { %3154 = vst [vmem:[#allocation29_spill] sm:$0xff] %v1882_v0  ;;  %s1715_s13 = smov 2   ;;  %s1716_s14 = smov 127   ;;  %v1960_v38 = vld [vmem:[#allocation10 + $0x2] ss:$8 sm:$0x3] }
  0x50   : > { %386 = vst [vmem:[#allocation1] ss:$2 sm:$0xff] %v1882_v0  ;;  %s1717_s15 = smov 126   ;;  %s1718_s16 = smov 125   ;;  %v1952_v37 = vand.u32 127, %v432_v36  ;;  %v492_v40 = vperm.slane %v1960_v38, 0 }
  0x51   : > { %s1922_s18 = sld [smem:[#allocation5 + $0x10]]  ;;  %v493_v41 = vperm.slane %v1960_v38, 1  ;;  %v1979_v44 = vld [vmem:[#allocation10] ss:$8 sm:$0x3] }
  0x52   : > { %s1924_s19 = sld [smem:[#allocation5 + $0x2]]  ;;  %vm482_vm1 = vcmp.lt.s32.totalorder %v1952_v37, 1  ;;  %v444_v47 = vperm.slane %v1979_v44, 0  ;;  %v445_v48 = vperm.slane %v1979_v44, 1  ;;  %vm434_vm2 = vcmp.lt.s32.totalorder %v1952_v37, 3 }
  0x53   : > { %s1926_s29 = sld [smem:[#allocation5 + $0xe]]  ;;  %v2007_v55 = vld [vmem:[#allocation10 + $0x1] ss:$8 sm:$0x3]  ;;  %vm458_vm3 = vcmp.lt.s32.totalorder %v1952_v37, 2  ;;  %vm517_vm4 = vcmp.lt.s32.totalorder %v1952_v37, 127 }
  0x54   : > { %s1928_s6 = sld [smem:[#allocation5]]  ;;  %vm541_vm5 = vcmp.lt.s32.totalorder %v1952_v37, 126  ;;  %vm565_vm6 = vcmp.lt.s32.totalorder %v1952_v37, 125  ;;  %vm823_vm7 = vcmp.lt.s32.totalorder %v1952_v37, 16  ;;  %vm655_vm8 = vcmp.lt.s32.totalorder %v1952_v37, 48 }
  0x55   : > { %s1930_s7 = sld [smem:[#allocation5 + $0x7]]  ;;  %vm984_vm9 = vcmp.lt.s32.totalorder %v1952_v37, 112  ;;  %vm739_vm10 = vcmp.lt.s32.totalorder %v1952_v37, 32  ;;  %vm1152_vm11 = vcmp.lt.s32.totalorder %v1952_v37, 80  ;;  %vm1068_vm13 = vcmp.lt.s32.totalorder %v1952_v37, 96 }
  0x56   : > { %s1932_s8 = sld [smem:[#allocation5 + $0x9]] }
  0x57   : > { %v387_v1 = vld.sshfl [vmem:[#allocation1] sm:$0xff pattern:$0x75316420]  ;;  %v388_v2 = vld.sshfl [vmem:[#allocation1 + $0x8] sm:$0xff pattern:$0x75316420]  ;;  %v767_v49 = vstv %s1922_s18 }
  0x58   : > { %v392_v3 = vsel %vm391_vm0, %v387_v1, 0.0  ;;  %408 = vst [vmem:[#allocation1] ss:$2 sm:$0xff] %v1882_v0  ;;  %v399_v4 = vsel %vm391_vm0, %v388_v2, 0.0  ;;  %s1934_s30 = sld [smem:[#allocation5 + $0x25]]  ;;  %v599_v50 = vstv %s1924_s19 }
  0x59   : > { %v393_v5 = vrot.slane %v392_v3, 4  ;;  %v400_v6 = vrot.slane %v399_v4, 4  ;;  %s1936_s10 = sld [smem:[#allocation5 + $0x3f]]  ;;  %v751_v51 = vstv %s1926_s29  ;;  %v501_v1 = vld [vmem:[#allocation10 + $0x3] ss:$8 sm:$0x3] }
  0x5a   : > { %s1938_s11 = sld [smem:[#allocation5 + $0x31]]  ;;  %v583_v52 = vstv %s1928_s6 }
  0x5b   : > { %v394_v7 = vadd.f32 %v393_v5, %v392_v3  ;;  %v401_v8 = vadd.f32 %v400_v6, %v399_v4  ;;  %s1954_s28 = sld [smem:[#allocation5 + $0x1]]  ;;  %v667_v58 = vstv %s1930_s7  ;;  %v3098_v6 = vperm.slane %v2007_v55, 0 }
  0x5c   : > { %s1956_s0 = sld [smem:[#allocation5 + $0x41]]  ;;  %v683_v53 = vstv %s1932_s8 }
  0x5d   : > { %v395_v9 = vrot.slane %v394_v7, 2  ;;  %v402_v10 = vrot.slane %v401_v8, 2  ;;  %s1958_s2 = sld [smem:[#allocation5 + $0x33]] }
  0x5e   : > { %3155 = sst [smem:[#allocation30_spill]] %s1934_s30  ;;  %v3086_v54 = vstv %s1934_s30 }
  0x5f   : > { %v396_v11 = vadd.f32 %v395_v9, %v394_v7  ;;  %v409_v12 = vld.sshfl [vmem:[#allocation1] sm:$0xff pattern:$0x75316420]  ;;  %v403_v13 = vadd.f32 %v402_v10, %v401_v8  ;;  %v410_v14 = vld.sshfl [vmem:[#allocation1 + $0x8] sm:$0xff pattern:$0x75316420]  ;;  %v754_v56 = vstv %s1936_s10 }
  0x60   : > { %v413_v15 = vsel %vm391_vm0, %v409_v12, -inf  ;;  %v420_v16 = vsel %vm391_vm0, %v410_v14, -inf  ;;  %s1962_s3 = sld [smem:[#allocation5 + $0x8]]  ;;  %v586_v57 = vstv %s1938_s11  ;;  %v3096_v7 = vperm.slane %v2007_v55, 1 }
  0x61   : > { %v397_v17 = vrot.slane %v396_v11, 1  ;;  %v414_v18 = vrot.slane %v413_v15, 4  ;;  %v421_v19 = vrot.slane %v420_v16, 4  ;;  %v404_v22 = vrot.slane %v403_v13, 1  ;;  %s1965_s4 = sld [smem:[#allocation5 + $0x3a]] }
  0x62   : > { %s1967_s24 = sld [smem:[#allocation5 + $0x24]]  ;;  %v503_v8 = vperm.slane %v501_v1, 0  ;;  %v504_v9 = vperm.slane %v501_v1, 1  ;;  %v3172_v38 = vstv %s1956_s0 }
  0x63   : > { %v398_v20 = vadd.f32 %v397_v17, %v396_v11  ;;  %v415_v21 = vmax.f32 %v413_v15, %v414_v18  ;;  %v422_v23 = vmax.f32 %v420_v16, %v421_v19  ;;  %v405_v28 = vadd.f32 %v404_v22, %v403_v13  ;;  %s1971_s22 = sld [smem:[#allocation5 + $0x4d]]  ;;  %v2054_v15 = vld [vmem:[#allocation10 + $0x4] ss:$8 sm:$0x3] }
  0x64   : > { %s1977_s17 = sld [smem:[#allocation5 + $0x11]]  ;;  %v591_v11 = vstv %s1954_s28 }
  0x65   : > { %v1890_v24 = vmul.f32 0.25, %v398_v20  ;;  %v416_v25 = vrot.slane %v415_v21, 2  ;;  %v423_v26 = vrot.slane %v422_v23, 2  ;;  %v1896_v32 = vmul.f32 0.25, %v405_v28  ;;  %s1981_s23 = sld [smem:[#allocation5 + $0x40]] }
  0x66   : > { %s1983_s26 = sld [smem:[#allocation5 + $0x42]]  ;;  %v675_v19 = vstv %s1962_s3 }
  0x67   : > { %428 = vrot.lane.b32.xlu0 %v1890_v24, %s1713_s25  ;;  %v417_v27 = vmax.f32 %v415_v21, %v416_v25  ;;  %478 = vrot.lane.b32.xlu2 %v1890_v24, %s1714_s12  ;;  %v424_v30 = vmax.f32 %v422_v23, %v423_v26  ;;  %3160 = sst [smem:[#allocation35_spill]] %s1965_s4  ;;  %v2059_v16 = vmul.f32 %v503_v8, %v1890_v24 }
  0x68   : > { %s1993_s20 = sld [smem:[#allocation5 + $0x3]]  ;;  %v2065_v18 = vmul.f32 %v504_v9, %v1896_v32 }
  0x69   : > { %v418_v29 = vrot.slane %v417_v27, 1  ;;  %v425_v33 = vrot.slane %v424_v30, 1  ;;  %s1998_s27 = sld [smem:[#allocation5 + $0x32]] }
  0x6a   : > { %s2002_s5 = sld [smem:[#allocation5 + $0x34]]  ;;  %3163 = vst [vmem:[#allocation38_spill] sm:$0xff] %v2065_v18  ;;  %v777_v21 = vstv %s1977_s17 }
  0x6b   : > { %v1894_v31 = vmax.f32 %v417_v27, %v418_v29  ;;  %v1901_v34 = vmax.f32 %v424_v30, %v425_v33  ;;  %s2011_s21 = sld [smem:[#allocation5 + $0xa]]  ;;  %v3103_v27 = vstv %s1971_s22  ;;  %v778_v28 = vmul.f32 %v777_v21, %v2059_v16 }
  0x6c   : > { %s2024_s18 = sld [smem:[#allocation5 + $0x39]] }
  0x6d   : > { %437 = vrot.lane.b32.xlu1 %v1894_v31, %s1713_s25  ;;  %s2027_s19 = sld [smem:[#allocation5 + $0x3b]]  ;;  %v2062_v17 = vmul.f32 %v503_v8, %v1894_v31  ;;  %v2077_v26 = vmul.f32 %v504_v9, %v1901_v34 }
  0x6e   : > { %s2046_s8 = sld [smem:[#allocation5 + $0x12]]  ;;  %v609_v30 = vstv %s1993_s20 }
  0x6f   : > { %430 = vrot.lane.b32.xlu0 %v1896_v32, %s1713_s25  ;;  %480 = vrot.lane.b32.xlu2 %v1896_v32, %s1714_s12  ;;  %s2049_s9 = sld [smem:[#allocation5 + $0x4]] }
  0x70   : > { %s2056_s1 = sld [smem:[#allocation5 + $0x43]] }
  0x71   : > { %s2072_s30 = sld [smem:[#allocation5 + $0x56]] }
  0x72   : > { %3162 = sst [smem:[#allocation37_spill]] %s2024_s18 }
  0x73   : > { %s2086_s17 = sld [smem:[#allocation5 + $0xb]] }
  0x74   : > { %s2088_s4 = sld [smem:[#allocation5 + $0x35]] }
  0x75   : > { %439 = vrot.lane.b32.xlu1 %v1901_v34, %s1713_s25  ;;  %s1940_s25 = sld [smem:[#allocation5 + $0x38]] }
  0x76   : > { %s2111_s20 = sld [smem:[#allocation5 + $0x57]] }
  0x77   : > { %456 = vrot.lane.b32.xlu0 %v1896_v32, %s1715_s13  ;;  %454 = vrot.lane.b32.xlu2 %v1890_v24, %s1715_s13  ;;  %s2152_s18 = sld [smem:[#allocation5 + $0xc]] }
  0x78   : > { %s2175_s6 = sld [smem:[#allocation5 + $0x27]] }
  0x79   : > { %s2193_s29 = sld [smem:[#allocation5 + $0x36]] }
  0x7a   : > { %s2205_s7 = sld [smem:[#allocation5 + $0x14]] }
  0x7b   : > { %v670_v59 = vstv %s1940_s25  ;;  %s2296_s3 = sld [smem:[#allocation5 + $0x45]] }
  0x7c   : > { %3165 = sst [smem:[#allocation40_spill]] %s2111_s20 }
  0x7d   : > { %487 = vrot.lane.b32.xlu1 %v1901_v34, %s1714_s12  ;;  %s3170_s28 = sld [smem:[#allocation35_spill]] }
  0x7e   : > { %s2312_s10 = sld [smem:[#allocation5 + $0x37]] }
  0x7f   : > { %485 = vrot.lane.b32.xlu0 %v1894_v31, %s1714_s12  ;;  %463 = vrot.lane.b32.xlu2 %v1901_v34, %s1715_s13  ;;  %s1942_s12 = sld [smem:[#allocation5 + $0x23]] }
  0x80   : > { %s2317_s25 = sld [smem:[#allocation5 + $0x3e]] }
  0x81   : > { %s3179_s0 = sld [smem:[#allocation37_spill]] }
  0x85   : > { %461 = vrot.lane.b32.xlu1 %v1894_v31, %s1715_s13  ;;  %3156 = sst [smem:[#allocation31_spill]] %s1942_s12  ;;  %v3094_v63 = vstv %s1942_s12 }
  0x86   : > { %s1944_s13 = sld [smem:[#allocation5 + $0x1e]] }
  0x87   : > { %513 = vrot.lane.b32.xlu0 %v1890_v24, %s1716_s14  ;;  %520 = vrot.lane.b32.xlu2 %v1894_v31, %s1716_s14  ;;  %s2246_s12 = sld [smem:[#allocation5 + $0x6]] }
  0x8c   : > { %3157 = sst [smem:[#allocation32_spill]] %s1944_s13 }
  0x8d   : > { %515 = vrot.lane.b32.xlu1 %v1896_v32, %s1716_s14  ;;  %s2181_s13 = sld [smem:[#allocation5 + $0x44]] }
  0x8f   : > { %522 = vrot.lane.b32.xlu0 %v1901_v34, %s1716_s14  ;;  %539 = vrot.lane.b32.xlu2 %v1896_v32, %s1717_s15  ;;  %s1946_s14 = sld [smem:[#allocation5 + $0x54]] }
  0x95   : > { %537 = vrot.lane.b32.xlu1 %v1890_v24, %s1717_s15  ;;  %3158 = sst [smem:[#allocation33_spill]] %s1946_s14  ;;  %v3101_v12 = vstv %s1946_s14 }
  0x96   : > { %s2079_s14 = sld [smem:[#allocation5 + $0x55]] }
  0x97   : > { %544 = vrot.lane.b32.xlu0 %v1894_v31, %s1717_s15  ;;  %561 = vrot.lane.b32.xlu2 %v1890_v24, %s1718_s16  ;;  %v780_v24 = vstv %s1983_s26  ;;  %s2096_s26 = sld [smem:[#allocation5 + $0x3c]] }
  0x98   : > { %v781_v29 = vmul.f32 %v780_v24, %v2062_v17  ;;  %s3169_s11 = sld [smem:[#allocation33_spill]] }
  0x9a   : > { %v2107_v9 = vadd.f32 %v781_v29, %v778_v28  ;;  %v779_v28 = vmul.f32 %v777_v21, %v2065_v18  ;;  %v782_v29 = vmul.f32 %v780_v24, %v2077_v26 }
  0x9d   : > { %546 = vrot.lane.b32.xlu1 %v1901_v34, %s1717_s15  ;;  %s1948_s15 = sld [smem:[#allocation5 + $0x1c]] }
  0x9f   : > { %563 = vrot.lane.b32.xlu0 %v1896_v32, %s1718_s16  ;;  %570 = vrot.lane.b32.xlu2 %v1901_v34, %s1718_s16  ;;  %v611_v32 = vmul.f32 %v609_v30, %v2065_v18  ;;  %v610_v34 = vmul.f32 %v609_v30, %v2059_v16 }
  0xa3   : > { %3159 = sst [smem:[#allocation34_spill]] %s1948_s15  ;;  %v3099_v13 = vstv %s1948_s15 }
  0xa4   : > { %s2259_s15 = sld [smem:[#allocation5 + $0xd]] }
  0xa5   : > { %568 = vrot.lane.b32.xlu1 %v1894_v31, %s1718_s16  ;;  %s1950_s16 = sld [smem:[#allocation5 + $0xf]]  ;;  %v612_v31 = vstv %s2002_s5 }
  0xa6   : > { %v614_v33 = vmul.f32 %v612_v31, %v2077_v26  ;;  %s2105_s5 = sld [smem:[#allocation5 + $0x26]] }
  0xa8   : > { %v2114_v25 = vadd.f32 %v614_v33, %v611_v32  ;;  %v3093_v33 = vstv %s2111_s20  ;;  %s2234_s20 = sld [smem:[#allocation5 + $0x58]] }
  0xab   : > { %v759_v10 = vstv %s1950_s16  ;;  %s2479_s16 = sld [smem:[#allocation5 + $0x1d]] }
  0xac   : > { %3164 = sst [smem:[#allocation39_spill]] %s2105_s5 }
  0xc1   : > { %v479_v35 = vpop.permute.xlu2 %478 }
  0xc9   : > { %v481_v39 = vpop.permute.xlu2 %480 }
  0xca   : > { %v483_v42 = vsel %vm482_vm1, %v479_v35, %v481_v39  ;;  %v484_v43 = vsel %vm482_vm1, %v481_v39, %v479_v35  ;;  %v613_v35 = vmul.f32 %v612_v31, %v2062_v17 }
  0xcb   : > { %v1987_v45 = vmul.f32 %v492_v40, %v484_v43  ;;  %v1991_v46 = vmul.f32 %v493_v41, %v483_v42  ;;  %v693_v42 = vstv %s2011_s21  ;;  %v696_v43 = vstv %s2027_s19  ;;  %s2124_s21 = sld [smem:[#allocation5 + $0x13]] }
  0xcc   : > { %v695_v1 = vmul.f32 %v693_v42, %v2065_v18  ;;  %v698_v8 = vmul.f32 %v696_v43, %v2077_v26  ;;  %v694_v30 = vmul.f32 %v693_v42, %v2059_v16  ;;  %v697_v31 = vmul.f32 %v696_v43, %v2062_v17  ;;  %s2140_s19 = sld [smem:[#allocation5 + $0x5]] }
  0xcd   : > { %3161 = vst [vmem:[#allocation36_spill] sm:$0xff] %v1991_v46  ;;  %v2016_v60 = vmul.f32 %v767_v49, %v1987_v45  ;;  %v2019_v61 = vmul.f32 %v599_v50, %v1991_v46  ;;  %v2022_v62 = vmul.f32 %v599_v50, %v1987_v45  ;;  %v2030_v2 = vmul.f32 %v683_v53, %v1991_v46 }
  0xce   : > { %v2033_v3 = vmul.f32 %v683_v53, %v1987_v45  ;;  %v2036_v4 = vmul.f32 %v767_v49, %v1991_v46  ;;  %v2041_v5 = vmul.f32 %v3086_v54, %v1987_v45  ;;  %v3102_v54 = vstv %s1967_s24 }
  0xcf   : > { %v2116_v53 = vadd.f32 %v613_v35, %v610_v34  ;;  %v2126_v32 = vadd.f32 %v698_v8, %v695_v1  ;;  %v2154_v35 = vadd.f32 %v782_v29, %v779_v28  ;;  %v3091_v28 = vstv %s2105_s5  ;;  %s2225_s5 = sld [smem:[#allocation5 + $0x3d]] }
  0xd1   : > { %v455_v24 = vpop.permute.xlu2 %454 }
  0xd9   : > { %v429_v14 = vpop.permute.xlu0 %428 }
  0xdf   : > { %v438_v49 = vpop.permute.xlu1 %437 }
  0xe1   : > { %v431_v36 = vpop.permute.xlu0 %430 }
  0xe2   : > { %v435_v42 = vsel %vm434_vm2, %v429_v14, %v431_v36  ;;  %v436_v43 = vsel %vm434_vm2, %v431_v36, %v429_v14  ;;  %v2157_v14 = vld [vmem:[#allocation10 + $0x5] ss:$8 sm:$0x3] }
  0xe3   : > { %v2131_v34 = vmul.f32 %v444_v47, %v436_v43  ;;  %v2135_v21 = vmul.f32 %v445_v48, %v435_v42  ;;  %v2144_v43 = vadd.f32 %v697_v31, %v694_v30 }
  0xe5   : > { %3166 = vst [vmem:[#allocation41_spill] sm:$0xff] %v2135_v21  ;;  %v752_v50 = vmul.f32 %v751_v51, %v2131_v34  ;;  %v585_v42 = vmul.f32 %v583_v52, %v2135_v21  ;;  %v584_v30 = vmul.f32 %v583_v52, %v2131_v34  ;;  %v669_v31 = vmul.f32 %v667_v58, %v2135_v21 }
  0xe6   : > { %v668_v29 = vmul.f32 %v667_v58, %v2131_v34  ;;  %v753_v36 = vmul.f32 %v751_v51, %v2135_v21 }
  0xe7   : > { %v440_v39 = vpop.permute.xlu1 %439 }
  0xe8   : > { %v441_v52 = vsel %vm434_vm2, %v438_v49, %v440_v39  ;;  %v442_v8 = vsel %vm434_vm2, %v440_v39, %v438_v49  ;;  %v997_v39 = vmul.f32 %v3094_v63, %v2131_v34  ;;  %v1023_v49 = vmul.f32 %v3091_v28, %v2059_v16 }
  0xe9   : > { %v2187_v58 = vmul.f32 %v444_v47, %v442_v8  ;;  %v2191_v51 = vmul.f32 %v445_v48, %v441_v52  ;;  %v457_v1 = vpop.permute.xlu0 %456  ;;  %v1026_v8 = vmul.f32 %v3093_v33, %v2062_v17  ;;  %v464_v48 = vpop.permute.xlu2 %463 }
  0xea   : > { %v459_v47 = vsel %vm458_vm3, %v455_v24, %v457_v1  ;;  %v460_v44 = vsel %vm458_vm3, %v457_v1, %v455_v24 }
  0xeb   : > { %3167 = vst [vmem:[#allocation42_spill] sm:$0xff] %v2191_v51  ;;  %v2213_v52 = vmul.f32 %v3098_v6, %v460_v44  ;;  %v2217_v28 = vmul.f32 %v3096_v7, %v459_v47  ;;  %v755_v24 = vmul.f32 %v754_v56, %v2187_v58  ;;  %v588_v1 = vmul.f32 %v586_v57, %v2191_v51 }
  0xec   : > { %v587_v63 = vmul.f32 %v586_v57, %v2187_v58  ;;  %v672_v44 = vmul.f32 %v670_v59, %v2191_v51  ;;  %v2239_v47 = vmul.f32 %v3099_v13, %v2135_v21 }
  0xed   : > { %3168 = vst [vmem:[#allocation43_spill] sm:$0xff] %v2217_v28  ;;  %v757_v7 = vadd.f32 %v755_v24, %v752_v50  ;;  %v2244_v33 = vmul.f32 %v759_v10, %v2213_v52  ;;  %v590_v57 = vadd.f32 %v588_v1, %v585_v42  ;;  %v2252_v23 = vmul.f32 %v591_v11, %v2217_v28 }
  0xee   : > { %v589_v13 = vadd.f32 %v587_v63, %v584_v30  ;;  %v2257_v22 = vmul.f32 %v591_v11, %v2213_v52  ;;  %v674_v50 = vadd.f32 %v672_v44, %v669_v31  ;;  %v2264_v20 = vmul.f32 %v675_v19, %v2217_v28  ;;  %v2277_v30 = vld [vmem:[#allocation10 + $0x6] ss:$8 sm:$0x3] }
  0xef   : > { %v488_v24 = vpop.permute.xlu1 %487  ;;  %v671_v42 = vmul.f32 %v670_v59, %v2187_v58  ;;  %v2272_v63 = vmul.f32 %v675_v19, %v2213_v52  ;;  %v756_v11 = vmul.f32 %v754_v56, %v2191_v51  ;;  %v2282_v31 = vmul.f32 %v759_v10, %v2217_v28 }
  0xf0   : > { %v1000_v1 = vmul.f32 %v3101_v12, %v2187_v58  ;;  %v2290_v59 = vmul.f32 %v3102_v54, %v2213_v52  ;;  %v2292_v19 = vadd.f32 %v1026_v8, %v1023_v49  ;;  %v3177_v12 = vmov %v3172_v38 }
  0xf1   : > { %v486_v44 = vpop.permute.xlu0 %485  ;;  %v673_v10 = vadd.f32 %v671_v42, %v668_v29  ;;  %v758_v56 = vadd.f32 %v756_v11, %v753_v36 }
  0xf2   : > { %v489_v54 = vsel %vm482_vm1, %v486_v44, %v488_v24  ;;  %v490_v49 = vsel %vm482_vm1, %v488_v24, %v486_v44  ;;  %v2319_v36 = vadd.f32 %v1000_v1, %v997_v39  ;;  %v3175_v39 = vstv %s3170_s28  ;;  %s1720_s28 = smov 48  }
  0xf3   : > { %v2306_v6 = vmul.f32 %v492_v40, %v490_v49  ;;  %v2310_v29 = vmul.f32 %v493_v41, %v489_v54  ;;  %v2325_v40 = vmul.f32 %v3103_v27, %v2191_v51  ;;  %v3173_v54 = vstv %s1958_s2  ;;  %s2379_s2 = sld [smem:[#allocation5 + $0x28]] }
  0xf4   : > { %v3174_v44 = vmov %v3173_v54  ;;  %v3176_v11 = vmov %v3175_v39 }
  0xf5   : > { %3171 = vst [vmem:[#allocation44_spill] sm:$0xff] %v2310_v29  ;;  %v771_v41 = vmul.f32 %v3172_v38, %v2306_v6  ;;  %v604_v49 = vmul.f32 %v3173_v54, %v2310_v29  ;;  %v603_v42 = vmul.f32 %v3174_v44, %v2306_v6  ;;  %v688_v1 = vmul.f32 %v3175_v39, %v2310_v29  ;;  %v521_v38 = vpop.permute.xlu2 %520 }
  0xf6   : > { %v687_v27 = vmul.f32 %v3176_v11, %v2306_v6  ;;  %v772_v0 = vmul.f32 %v3177_v12, %v2310_v29  ;;  %v3178_v44 = vstv %s2072_s30 }
  0xf7   : > { %v462_v51 = vpop.permute.xlu1 %461  ;;  %v773_v21 = vadd.f32 %v771_v41, %v2016_v60  ;;  %v606_v54 = vadd.f32 %v604_v49, %v2019_v61  ;;  %v605_v24 = vadd.f32 %v603_v42, %v2022_v62  ;;  %v1016_v39 = vmul.f32 %v3178_v44, %v2306_v6 }
  0xf8   : > { %v465_v11 = vsel %vm458_vm3, %v462_v51, %v464_v48  ;;  %v466_v12 = vsel %vm458_vm3, %v464_v48, %v462_v51  ;;  %v690_v8 = vadd.f32 %v688_v1, %v2030_v2  ;;  %v689_v60 = vadd.f32 %v687_v27, %v2033_v3 }
  0xf9   : > { %v3180_v61 = vperm.slane %v2007_v55, 0  ;;  %v3181_v42 = vperm.slane %v2007_v55, 1  ;;  %v514_v49 = vpop.permute.xlu0 %513  ;;  %v2368_v44 = vadd.f32 %v773_v21, %v757_v7  ;;  %v2371_v48 = vadd.f32 %v606_v54, %v590_v57 }
  0xfa   : > { %v2373_v2 = vadd.f32 %v605_v24, %v589_v13  ;;  %v2375_v3 = vadd.f32 %v690_v8, %v674_v50  ;;  %v2377_v27 = vadd.f32 %v689_v60, %v673_v10  ;;  %v3183_v55 = vstv %s1981_s23  ;;  %s2447_s23 = sld [smem:[#allocation5 + $0x59]] }
  0xfb   : > { %v2362_v62 = vmul.f32 %v3180_v61, %v466_v12  ;;  %v2366_v41 = vmul.f32 %v3181_v42, %v465_v11  ;;  %v3184_v11 = vstv %s1998_s27  ;;  %v3186_v13 = vstv %s3179_s0  ;;  %s2465_s27 = sld [smem:[#allocation5 + $0x29]] }
  0xfc   : > { %v3185_v21 = vmov %v3184_v11  ;;  %v3187_v10 = vmov %v3186_v13  ;;  %v3188_v54 = vmov %v3183_v55  ;;  %s2763_s0 = sld [smem:[#allocation5 + $0x2d]] }
  0xfd   : > { %3182 = vst [vmem:[#allocation45_spill] sm:$0xff] %v2366_v41  ;;  %v763_v1 = vmul.f32 %v3183_v55, %v2362_v62  ;;  %v596_v12 = vmul.f32 %v3184_v11, %v2366_v41  ;;  %v595_v57 = vmul.f32 %v3185_v21, %v2362_v62  ;;  %v680_v24 = vmul.f32 %v3186_v13, %v2366_v41 }
  0xfe   : > { %v679_v8 = vmul.f32 %v3187_v10, %v2362_v62  ;;  %v764_v60 = vmul.f32 %v3188_v54, %v2366_v41  ;;  %v774_v11 = vadd.f32 %v772_v0, %v2036_v4  ;;  %v3189_v10 = vstv %s2079_s14 }
  0xff   : > { %v765_v61 = vadd.f32 %v763_v1, %v2244_v33  ;;  %v598_v42 = vadd.f32 %v596_v12, %v2252_v23  ;;  %v597_v55 = vadd.f32 %v595_v57, %v2257_v22  ;;  %v682_v21 = vadd.f32 %v680_v24, %v2264_v20  ;;  %v516_v54 = vpop.permute.xlu1 %515 }
 0x100   : > { %v681_v13 = vadd.f32 %v679_v8, %v2272_v63  ;;  %v766_v50 = vadd.f32 %v764_v60, %v2282_v31  ;;  %v1008_v7 = vmul.f32 %v3189_v10, %v2362_v62  ;;  %v776_v0 = vadd.f32 %v774_v11, %v758_v56 }
 0x101   : > { %v2413_v51 = vadd.f32 %v2107_v9, %v765_v61  ;;  %v2416_v33 = vadd.f32 %v2114_v25, %v598_v42  ;;  %v2419_v22 = vadd.f32 %v2116_v53, %v597_v55  ;;  %v518_v4 = vsel %vm517_vm4, %v514_v49, %v516_v54  ;;  %v523_v56 = vpop.permute.xlu0 %522 }
 0x102   : > { %v519_v20 = vsel %vm517_vm4, %v516_v54, %v514_v49  ;;  %v2426_v23 = vadd.f32 %v2126_v32, %v682_v21  ;;  %v2429_v9 = vadd.f32 %v2144_v43, %v681_v13  ;;  %v3190_v25 = vperm.slane %v2054_v15, 0  ;;  %v540_v49 = vpop.permute.xlu2 %539 }
 0x103   : > { %v3192_v63 = vperm.slane %v2054_v15, 1  ;;  %v2440_v32 = vadd.f32 %v2154_v35, %v766_v50  ;;  %v1010_v43 = vadd.f32 %v1008_v7, %v2290_v59  ;;  %v524_v1 = vsel %vm517_vm4, %v521_v38, %v523_v56 }
 0x104   : > { %v2433_v53 = vmul.f32 %v3190_v25, %v518_v4  ;;  %v525_v12 = vsel %vm517_vm4, %v523_v56, %v521_v38  ;;  %v1018_v57 = vadd.f32 %v1016_v39, %v2041_v5  ;;  %v3109_v24 = vstv %s2379_s2 }
 0x105   : > { %v2437_v31 = vmul.f32 %v3192_v63, %v519_v20  ;;  %v3193_v35 = vmov %v3190_v25  ;;  %v3195_v59 = vmov %v3192_v63  ;;  %v3196_v8 = vstv %s2046_s8  ;;  %s2505_s8 = sld [smem:[#allocation5 + $0x4e]] }
 0x106   : > { %3191 = vst [vmem:[#allocation46_spill] sm:$0xff] %v2433_v53  ;;  %v2453_v50 = vmul.f32 %v3193_v35, %v524_v1  ;;  %v2457_v7 = vmul.f32 %v3195_v59, %v525_v12  ;;  %v788_v38 = vmul.f32 %v3196_v8, %v2433_v53  ;;  %v3197_v60 = vstv %s2049_s9  ;;  %s2493_s9 = sld [smem:[#allocation5 + $0x5a]] }
 0x107   : > { %v621_v61 = vmul.f32 %v3197_v60, %v2437_v31  ;;  %v3198_v5 = vmov %v3197_v60  ;;  %v3199_v42 = vstv %s2086_s17  ;;  %v3201_v21 = vmov %v3196_v8  ;;  %s3216_s17 = sld [smem:[#allocation32_spill]] }
 0x108   : > { %3194 = vst [vmem:[#allocation47_spill] sm:$0xff] %v2453_v50  ;;  %v620_v39 = vmul.f32 %v3198_v5, %v2433_v53  ;;  %v705_v55 = vmul.f32 %v3199_v42, %v2437_v31  ;;  %v3200_v11 = vmov %v3199_v42  ;;  %v789_v13 = vmul.f32 %v3201_v21, %v2437_v31  ;;  %v538_v42 = vpop.permute.xlu1 %537 }
 0x109   : > { %v704_v15 = vmul.f32 %v3200_v11, %v2433_v53  ;;  %v3202_v10 = vstv %s2056_s1  ;;  %v3203_v4 = vstv %s2088_s4  ;;  %v3205_v56 = vstv %s2096_s26  ;;  %s2508_s4 = sld [smem:[#allocation5 + $0x4f]] }
 0x10a   : > { %v791_v54 = vmul.f32 %v3202_v10, %v2453_v50  ;;  %v624_v20 = vmul.f32 %v3203_v4, %v2457_v7  ;;  %v3204_v25 = vmov %v3203_v4  ;;  %v708_v1 = vmul.f32 %v3205_v56, %v2457_v7  ;;  %s2528_s1 = sld [smem:[#allocation5 + $0x1f]] }
 0x10b   : > { %v623_v63 = vmul.f32 %v3204_v25, %v2453_v50  ;;  %v3206_v12 = vmov %v3205_v56  ;;  %v3207_v59 = vmov %v3202_v10  ;;  %v1020_v60 = vadd.f32 %v1018_v57, %v2319_v36  ;;  %s2705_s26 = sld [smem:[#allocation5 + $0x51]] }
 0x10c   : > { %v707_v35 = vmul.f32 %v3206_v12, %v2453_v50  ;;  %v792_v8 = vmul.f32 %v3207_v59, %v2457_v7  ;;  %v2503_v5 = vadd.f32 %v2292_v19, %v1010_v43  ;;  %v793_v11 = vadd.f32 %v791_v54, %v788_v38 }
 0x10d   : > { %v626_v21 = vadd.f32 %v624_v20, %v621_v61  ;;  %v625_v10 = vadd.f32 %v623_v63, %v620_v39  ;;  %v710_v4 = vadd.f32 %v708_v1, %v705_v55  ;;  %v542_v25 = vsel %vm541_vm5, %v538_v42, %v540_v49  ;;  %v545_v55 = vpop.permute.xlu0 %544  ;;  %v562_v63 = vpop.permute.xlu2 %561 }
 0x10e   : > { %v543_v19 = vsel %vm541_vm5, %v540_v49, %v538_v42  ;;  %v709_v36 = vadd.f32 %v707_v35, %v704_v15  ;;  %v794_v43 = vadd.f32 %v792_v8, %v789_v13  ;;  %v3208_v57 = vperm.slane %v2157_v14, 0 }
 0x10f   : > { %v3210_v61 = vperm.slane %v2157_v14, 1  ;;  %v2523_v54 = vadd.f32 %v793_v11, %v2368_v44  ;;  %v2526_v49 = vadd.f32 %v626_v21, %v2371_v48  ;;  %v2531_v15 = vadd.f32 %v625_v10, %v2373_v2 }
 0x110   : > { %v2516_v38 = vmul.f32 %v3208_v57, %v542_v25  ;;  %v2534_v13 = vadd.f32 %v710_v4, %v2375_v3  ;;  %v2537_v20 = vadd.f32 %v709_v36, %v2377_v27  ;;  %v2539_v44 = vadd.f32 %v794_v43, %v776_v0 }
 0x111   : > { %v2520_v39 = vmul.f32 %v3210_v61, %v543_v19  ;;  %v3211_v48 = vstv %s2124_s21  ;;  %v3212_v1 = vstv %s2140_s19  ;;  %v3214_v3 = vstv %s2152_s18  ;;  %s2689_s18 = sld [smem:[#allocation5 + $0x22]] }
 0x112   : > { %3209 = vst [vmem:[#allocation48_spill] sm:$0xff] %v2516_v38  ;;  %v798_v56 = vmul.f32 %v3211_v48, %v2516_v38  ;;  %v3213_v2 = vmov %v3212_v1  ;;  %v3215_v0 = vmov %v3214_v3  ;;  %v3217_v8 = vmov %v3211_v48  ;;  %s2717_s21 = sld [smem:[#allocation5 + $0x53]] }
 0x113   : > { %v631_v12 = vmul.f32 %v3212_v1, %v2520_v39  ;;  %v630_v35 = vmul.f32 %v3213_v2, %v2516_v38  ;;  %v715_v27 = vmul.f32 %v3214_v3, %v2520_v39  ;;  %v714_v59 = vmul.f32 %v3215_v0, %v2516_v38  ;;  %v547_v2 = vpop.permute.xlu1 %546  ;;  %s3248_s19 = sld [smem:[#allocation34_spill]] }
 0x114   : > { %v799_v42 = vmul.f32 %v3217_v8, %v2520_v39  ;;  %v3218_v11 = vstv %s2175_s6  ;;  %v3219_v10 = vstv %s2234_s20  ;;  %v2568_v25 = vmul.f32 %v3109_v24, %v2516_v38 }
 0x115   : > { %v1033_v21 = vmul.f32 %v3218_v11, %v2433_v53  ;;  %v1036_v4 = vmul.f32 %v3219_v10, %v2453_v50  ;;  %v919_v61 = vadd.f32 %v2325_v40, %v2239_v47  ;;  %v3111_v48 = vstv %s2479_s16  ;;  %v564_v43 = vpop.permute.xlu0 %563 }
 0x116   : > { %v3110_v1 = vstv %s2505_s8  ;;  %v922_v3 = vmul.f32 %v3111_v48, %v2217_v28  ;;  %v3220_v8 = vstv %s3216_s17  ;;  %v3113_v10 = vstv %s2508_s4 }
 0x117   : > { %v1038_v57 = vadd.f32 %v1036_v4, %v1033_v21  ;;  %v925_v0 = vmul.f32 %v3110_v1, %v2366_v41  ;;  %v930_v11 = vmul.f32 %v3220_v8, %v1991_v46  ;;  %v548_v21 = vsel %vm541_vm5, %v545_v55, %v547_v2 }
 0x118   : > { %v549_v47 = vsel %vm541_vm5, %v547_v2, %v545_v55  ;;  %v933_v4 = vmul.f32 %v3113_v10, %v2310_v29  ;;  %v3221_v24 = vperm.slane %v2157_v14, 0  ;;  %v3222_v1 = vperm.slane %v2157_v14, 1 }
 0x119   : > { %v2591_v40 = vadd.f32 %v1038_v57, %v1020_v60  ;;  %v2604_v36 = vadd.f32 %v925_v0, %v922_v3  ;;  %v3112_v60 = vstv %s2528_s1  ;;  %v566_v55 = vsel %vm565_vm6, %v562_v63, %v564_v43 }
 0x11a   : > { %v2598_v8 = vmul.f32 %v3221_v24, %v548_v21  ;;  %v2602_v48 = vmul.f32 %v3222_v1, %v549_v47  ;;  %v567_v57 = vsel %vm565_vm6, %v564_v43, %v562_v63  ;;  %v935_v2 = vadd.f32 %v933_v4, %v930_v11 }
 0x11b   : > { %v2614_v14 = vmul.f32 %v3112_v60, %v2065_v18  ;;  %v3223_v24 = vperm.slane %v2277_v30, 0  ;;  %v3224_v3 = vperm.slane %v2277_v30, 1  ;;  %v3225_v21 = vstv %s2181_s13  ;;  %v569_v53 = vpop.permute.xlu1 %568  ;;  %s2659_s13 = sld [smem:[#allocation5 + $0x20]] }
 0x11c   : > { %v801_v47 = vmul.f32 %v3225_v21, %v2598_v8  ;;  %v3226_v63 = vstv %s2193_s29  ;;  %v3228_v60 = vstv %s2225_s5  ;;  %v3230_v19 = vmov %v3225_v21  ;;  %s2715_s5 = sld [smem:[#allocation5 + $0x52]] }
 0x11d   : > { %v2618_v1 = vmul.f32 %v3223_v24, %v566_v55  ;;  %v2622_v0 = vmul.f32 %v3224_v3, %v567_v57  ;;  %v634_v43 = vmul.f32 %v3226_v63, %v2602_v48  ;;  %v3227_v11 = vmov %v3226_v63  ;;  %v571_v3 = vpop.permute.xlu2 %570  ;;  %s2730_s29 = sld [smem:[#allocation5 + $0x2a]] }
 0x11e   : > { %v633_v4 = vmul.f32 %v3227_v11, %v2598_v8  ;;  %v718_v10 = vmul.f32 %v3228_v60, %v2602_v48  ;;  %v3229_v55 = vmov %v3228_v60  ;;  %v802_v57 = vmul.f32 %v3230_v19, %v2602_v48 }
 0x11f   : > { %v717_v24 = vmul.f32 %v3229_v55, %v2598_v8  ;;  %v803_v18 = vadd.f32 %v801_v47, %v798_v56  ;;  %v3231_v21 = vstv %s2205_s7  ;;  %v636_v46 = vadd.f32 %v634_v43, %v631_v12  ;;  %s2734_s7 = sld [smem:[#allocation5 + $0x2c]] }
 0x120   : > { %v808_v29 = vmul.f32 %v3231_v21, %v2618_v1  ;;  %v3232_v63 = vstv %s2246_s12  ;;  %v635_v11 = vadd.f32 %v633_v4, %v630_v35  ;;  %v720_v38 = vadd.f32 %v718_v10, %v715_v27  ;;  %s2667_s12 = sld [smem:[#allocation5 + $0x50]] }
 0x121   : > { %v641_v41 = vmul.f32 %v3232_v63, %v2622_v0  ;;  %v3233_v28 = vmov %v3232_v63  ;;  %v3234_v50 = vstv %s2259_s15  ;;  %v805_v19 = vadd.f32 %v803_v18, %v2413_v51  ;;  %s2678_s15 = sld [smem:[#allocation5 + $0x21]] }
 0x122   : > { %v640_v60 = vmul.f32 %v3233_v28, %v2618_v1  ;;  %v725_v55 = vmul.f32 %v3234_v50, %v2622_v0  ;;  %v638_v56 = vadd.f32 %v636_v46, %v2416_v33  ;;  %v719_v12 = vadd.f32 %v717_v24, %v714_v59 }
 0x123   : > { %v3235_v47 = vmov %v3234_v50  ;;  %v572_v28 = vsel %vm565_vm6, %v569_v53, %v571_v3  ;;  %v573_v50 = vsel %vm565_vm6, %v571_v3, %v569_v53  ;;  %v637_v18 = vadd.f32 %v635_v11, %v2419_v22 }
 0x124   : > { %v724_v43 = vmul.f32 %v3235_v47, %v2618_v1  ;;  %v722_v46 = vadd.f32 %v720_v38, %v2426_v23  ;;  %v3236_v51 = vperm.slane %v2277_v30, 0  ;;  %v3237_v35 = vperm.slane %v2277_v30, 1 }
 0x125   : > { %v721_v53 = vadd.f32 %v719_v12, %v2429_v9  ;;  %v804_v59 = vadd.f32 %v802_v57, %v799_v42  ;;  %v3238_v22 = vmov %v3231_v21  ;;  %v3239_v38 = vstv %s2447_s23 }
 0x126   : > { %v2671_v33 = vmul.f32 %v3236_v51, %v572_v28  ;;  %v2675_v27 = vmul.f32 %v3237_v35, %v573_v50  ;;  %v809_v23 = vmul.f32 %v3238_v22, %v2622_v0  ;;  %v1046_v10 = vmul.f32 %v3239_v38, %v2598_v8 }
 0x127   : > { %v3240_v4 = vstv %s2465_s27  ;;  %v2691_v30 = vadd.f32 %v935_v2, %v919_v61  ;;  %v3241_v3 = vstv %s2296_s3  ;;  %v3242_v9 = vstv %s2312_s10  ;;  %s1719_s3 = smov 16   ;;  %s2745_s10 = sld [smem:[#allocation5 + $0x5b]] }
 0x128   : > { %v1053_v24 = vmul.f32 %v3240_v4, %v2618_v1  ;;  %v811_v21 = vmul.f32 %v3241_v3, %v2671_v33  ;;  %v644_v42 = vmul.f32 %v3242_v9, %v2675_v27  ;;  %v3243_v57 = vmov %v3242_v9 }
 0x129   : > { %v643_v63 = vmul.f32 %v3243_v57, %v2671_v33  ;;  %v3244_v11 = vstv %s2317_s25  ;;  %v806_v61 = vadd.f32 %v804_v59, %v2440_v32  ;;  %v3246_v2 = vmov %v3241_v3  ;;  %s2752_s25 = sld [smem:[#allocation5 + $0x2b]] }
 0x12a   : > { %v728_v12 = vmul.f32 %v3244_v11, %v2675_v27  ;;  %v3245_v47 = vmov %v3244_v11  ;;  %v812_v50 = vmul.f32 %v3246_v2, %v2675_v27  ;;  %v1048_v51 = vadd.f32 %v1046_v10, %v2568_v25 }
 0x12b   : > { %v727_v28 = vmul.f32 %v3245_v47, %v2671_v33  ;;  %v813_v35 = vadd.f32 %v811_v21, %v808_v29  ;;  %v646_v22 = vadd.f32 %v644_v42, %v641_v41  ;;  %v645_v38 = vadd.f32 %v643_v63, %v640_v60 }
 0x12c   : > { %v730_v4 = vadd.f32 %v728_v12, %v725_v55  ;;  %v814_v9 = vadd.f32 %v812_v50, %v809_v23  ;;  %v1050_v57 = vadd.f32 %v1048_v51, %v2503_v5  ;;  %v3247_v32 = vstv %s2493_s9 }
 0x12d   : > { %v729_v3 = vadd.f32 %v727_v28, %v724_v43  ;;  %v1056_v59 = vmul.f32 %v3247_v32, %v2671_v33  ;;  %v815_v11 = vadd.f32 %v813_v35, %v2523_v54  ;;  %v648_v25 = vadd.f32 %v646_v22, %v2526_v49 }
 0x12e   : > { %v647_v10 = vadd.f32 %v645_v38, %v2531_v15  ;;  %v732_v29 = vadd.f32 %v730_v4, %v2534_v13  ;;  %v816_v60 = vadd.f32 %v814_v9, %v2539_v44  ;;  %v941_v43 = vstv %s2667_s12  ;;  %s2779_s12 = sld [smem:[#allocation5 + $0x5c]] }
 0x12f   : > { %v731_v41 = vadd.f32 %v729_v3, %v2537_v20  ;;  %v1058_v55 = vadd.f32 %v1056_v59, %v1053_v24  ;;  %v817_v5 = vadd.f32 %v815_v11, %v805_v19  ;;  %v650_v23 = vadd.f32 %v648_v25, %v638_v56 }
 0x130   : > { %v649_v21 = vadd.f32 %v647_v10, %v637_v18  ;;  %v734_v54 = vadd.f32 %v732_v29, %v722_v46  ;;  %v818_v15 = vadd.f32 %v816_v60, %v806_v61  ;;  %v943_v20 = vmul.f32 %v941_v43, %v2077_v26 }
 0x131   : > { %v733_v49 = vadd.f32 %v731_v41, %v721_v53  ;;  %v1060_v13 = vadd.f32 %v1058_v55, %v2591_v40  ;;  %819 = vrot.lane.b32.xlu2 %v817_v5, %s1719_s3  ;;  %653 = vrot.lane.b32.xlu1 %v650_v23, %s1720_s28  ;;  %v948_v44 = vstv %s2659_s13  ;;  %v951_v19 = vstv %s2705_s26  ;;  %s2770_s13 = sld [smem:[#allocation5 + $0x2e]]  ;;  %v3256_v23 = vld [vmem:[#allocation46_spill] sm:$0xff]  ;;  %s1722_s26 = smov 96  }
 0x132   : > { %v3249_v56 = vstv %s3248_s19  ;;  %v3250_v40 = vstv %s1971_s22  ;;  %651 = vrot.lane.b32.xlu0 %v649_v21, %s1720_s28  ;;  %v945_v24 = vadd.f32 %v943_v20, %v2614_v14  ;;  %v950_v42 = vmul.f32 %v948_v44, %v2437_v31  ;;  %s2758_s22 = sld [smem:[#allocation5 + $0x5d]] }
 0x133   : > { %v913_v18 = vmul.f32 %v3249_v56, %v2131_v34  ;;  %v916_v46 = vmul.f32 %v3250_v40, %v2187_v58  ;;  %v2747_v53 = vadd.f32 %v1060_v13, %v1050_v57  ;;  %v953_v63 = vmul.f32 %v951_v19, %v2457_v7  ;;  %v3257_v13 = vld [vmem:[#allocation47_spill] sm:$0xff]  ;;  %s3267_s19 = sld [smem:[#allocation30_spill]] }
 0x134   : > { %v958_v12 = vstv %s2678_s15  ;;  %v961_v47 = vstv %s2715_s5  ;;  %v968_v28 = vstv %s2689_s18  ;;  %v971_v61 = vstv %s2717_s21  ;;  %s2804_s15 = sld [smem:[#allocation5 + $0x60]]  ;;  %s1723_s5 = smov 112  }
 0x135   : > { %v947_v2 = vadd.f32 %v945_v24, %v2604_v36  ;;  %v955_v50 = vadd.f32 %v953_v63, %v950_v42  ;;  %v960_v14 = vmul.f32 %v958_v12, %v2520_v39  ;;  %v963_v51 = vmul.f32 %v961_v47, %v2602_v48  ;;  %v3258_v24 = vld [vmem:[#allocation48_spill] sm:$0xff]  ;;  %s2809_s18 = sld [smem:[#allocation5 + $0x61]] }
 0x136   : > { %v970_v35 = vmul.f32 %v968_v28, %v2622_v0  ;;  %v973_v22 = vmul.f32 %v971_v61, %v2675_v27  ;;  %v918_v38 = vadd.f32 %v916_v46, %v913_v18  ;;  %v3251_v4 = vstv %s2479_s16  ;;  %s2788_s16 = sld [smem:[#allocation5 + $0x2f]] }
 0x137   : > { %v921_v3 = vmul.f32 %v3251_v4, %v2213_v52  ;;  %v957_v36 = vadd.f32 %v955_v50, %v2691_v30  ;;  %v965_v9 = vadd.f32 %v963_v51, %v960_v14  ;;  %v3252_v57 = vstv %s2505_s8  ;;  %s2792_s8 = sld [smem:[#allocation5 + $0x5e]]  ;;  %v3259_v50 = vld [vmem:[#allocation41_spill] sm:$0xff] }
 0x138   : > { %v924_v32 = vmul.f32 %v3252_v57, %v2362_v62  ;;  %v3253_v59 = vstv %s3216_s17  ;;  %v975_v25 = vadd.f32 %v973_v22, %v970_v35  ;;  %v3254_v10 = vstv %s2508_s4  ;;  %s1721_s17 = smov 32   ;;  %s2794_s4 = sld [smem:[#allocation5 + $0x5f]]  ;;  %v3260_v35 = vld [vmem:[#allocation42_spill] sm:$0xff] }
 0x139   : > { %v929_v11 = vmul.f32 %v3253_v59, %v1987_v45  ;;  %v932_v29 = vmul.f32 %v3254_v10, %v2306_v6  ;;  %v3255_v41 = vstv %s2528_s1  ;;  %v942_v55 = vmul.f32 %v941_v43, %v2062_v17  ;;  %737 = vrot.lane.b32.xlu2 %v734_v54, %s1721_s17  ;;  %735 = vrot.lane.b32.xlu1 %v733_v49, %s1721_s17  ;;  %s2801_s1 = sld [smem:[#allocation5 + $0x30]]  ;;  %v3262_v59 = vld [vmem:[#allocation45_spill] sm:$0xff] }
 0x13a   : > { %v939_v60 = vmul.f32 %v3255_v41, %v2059_v16  ;;  %v967_v30 = vadd.f32 %v965_v9, %v947_v2  ;;  %v926_v5 = vadd.f32 %v924_v32, %v921_v3  ;;  %v949_v21 = vmul.f32 %v948_v44, %v3256_v23  ;;  %821 = vrot.lane.b32.xlu0 %v818_v15, %s1719_s3  ;;  %s3266_s21 = sld [smem:[#allocation31_spill]]  ;;  %s1724_s3 = smov 80  }
 0x13b   : > { %v952_v20 = vmul.f32 %v951_v19, %v3257_v13  ;;  %v977_v56 = vadd.f32 %v975_v25, %v957_v36  ;;  %v934_v18 = vadd.f32 %v932_v29, %v929_v11  ;;  %v1080_v43 = vstv %s2730_s29  ;;  %v3263_v25 = vld [vmem:[#allocation36_spill] sm:$0xff]  ;;  %v3264_v29 = vld [vmem:[#allocation44_spill] sm:$0xff]  ;;  %s3268_s29 = sld [smem:[#allocation39_spill]] }
 0x13c   : > { %v944_v40 = vadd.f32 %v942_v55, %v939_v60  ;;  %v959_v44 = vmul.f32 %v958_v12, %v3258_v24  ;;  %v962_v19 = vmul.f32 %v961_v47, %v2598_v8  ;;  %v969_v42 = vmul.f32 %v968_v28, %v2618_v1  ;;  %s2920_s28 = sld [smem:[#allocation5 + $0x4c]] }
 0x13d   : > { %v954_v46 = vadd.f32 %v952_v20, %v949_v21  ;;  %v979_v54 = vadd.f32 %v977_v56, %v967_v30  ;;  %v936_v49 = vadd.f32 %v934_v18, %v918_v38  ;;  %v972_v2 = vmul.f32 %v971_v61, %v2671_v33  ;;  %v3261_v38 = vld [vmem:[#allocation43_spill] sm:$0xff]  ;;  %v3265_v20 = vld [vmem:[#allocation38_spill] sm:$0xff] }
 0x13e   : > { %v946_v63 = vadd.f32 %v944_v40, %v926_v5  ;;  %v964_v15 = vadd.f32 %v962_v19, %v959_v44  ;;  %v1082_v14 = vmul.f32 %v1080_v43, %v3259_v50  ;;  %v1083_v12 = vstv %s2745_s10  ;;  %s2922_s10 = sld [smem:[#allocation5 + $0x4b]] }
 0x13f   : > { %v1088_v47 = vstv %s2752_s25  ;;  %v956_v28 = vadd.f32 %v954_v46, %v936_v49  ;;  %v974_v51 = vadd.f32 %v972_v2, %v969_v42  ;;  %v1085_v22 = vmul.f32 %v1083_v12, %v3260_v35  ;;  %s2924_s25 = sld [smem:[#allocation5 + $0x1b]] }
 0x140   : > { %v1090_v4 = vmul.f32 %v1088_v47, %v3261_v38  ;;  %v966_v3 = vadd.f32 %v964_v15, %v946_v63  ;;  %v1091_v61 = vstv %s2779_s12  ;;  %v1096_v36 = vstv %s2734_s7  ;;  %s3269_s7 = sld [smem:[#allocation40_spill]] }
 0x141   : > { %v1099_v9 = vstv %s2758_s22  ;;  %v976_v57 = vadd.f32 %v974_v51, %v956_v28  ;;  %v1087_v32 = vadd.f32 %v1085_v22, %v1082_v14  ;;  %v1093_v11 = vmul.f32 %v1091_v61, %v3262_v59  ;;  %1064 = vrot.lane.b32.xlu2 %v2747_v53, %s1722_s26  ;;  %982 = vrot.lane.b32.xlu1 %v979_v54, %s1723_s5  ;;  %s2927_s22 = sld [smem:[#allocation5 + $0x1a]] }
 0x142   : > { %v1098_v10 = vmul.f32 %v1096_v36, %v3263_v25  ;;  %v1101_v41 = vmul.f32 %v1099_v9, %v3264_v29  ;;  %v1106_v60 = vstv %s2763_s0  ;;  %v1109_v55 = vstv %s2792_s8  ;;  %s383_s0 = sld [smem:[#allocation4]] }
 0x143   : > { %v1116_v30 = vstv %s2770_s13  ;;  %v978_v5 = vadd.f32 %v976_v57, %v966_v3  ;;  %v1095_v21 = vadd.f32 %v1093_v11, %v1090_v4  ;;  %v1108_v56 = vmul.f32 %v1106_v60, %v3265_v20  ;;  %s3284_s13 = sld [smem:[#allocation23_spill]] }
 0x144   : > { %v1119_v18 = vstv %s2794_s4  ;;  %v1103_v40 = vadd.f32 %v1101_v41, %v1098_v10  ;;  %v1111_v46 = vmul.f32 %v1109_v55, %v2077_v26  ;;  %v1118_v44 = vmul.f32 %v1116_v30, %v2437_v31  ;;  %s3285_s12 = sld [smem:[#allocation28_spill]] }
 0x145   : > { %v1121_v19 = vmul.f32 %v1119_v18, %v2457_v7  ;;  %980 = vrot.lane.b32.xlu0 %v978_v5, %s1723_s5  ;;  %v1126_v42 = vstv %s2788_s16  ;;  %v1129_v49 = vstv %s2804_s15  ;;  %v1136_v63 = vstv %s2801_s1  ;;  %s3286_s8 = sld [smem:[#allocation20_spill]] }
 0x146   : > { %v1081_v53 = vmul.f32 %v1080_v43, %v2131_v34  ;;  %v1105_v54 = vadd.f32 %v1103_v40, %v1087_v32  ;;  %v1113_v2 = vadd.f32 %v1111_v46, %v1108_v56  ;;  %v1128_v14 = vmul.f32 %v1126_v42, %v2520_v39  ;;  %s3287_s1 = sld [smem:[#allocation53_spill]] }
 0x147   : > { %v1123_v15 = vadd.f32 %v1121_v19, %v1118_v44  ;;  %v1131_v28 = vmul.f32 %v1129_v49, %v2602_v48  ;;  %v1138_v51 = vmul.f32 %v1136_v63, %v2622_v0  ;;  %v1139_v22 = vstv %s2809_s18 }
 0x148   : > { %v1084_v4 = vmul.f32 %v1083_v12, %v2187_v58  ;;  %v1115_v3 = vadd.f32 %v1113_v2, %v1095_v21  ;;  %v1141_v11 = vmul.f32 %v1139_v22, %v2675_v27  ;;  %v1089_v10 = vmul.f32 %v1088_v47, %v2213_v52 }
 0x149   : > { %v1125_v57 = vadd.f32 %v1123_v15, %v1105_v54  ;;  %v1133_v41 = vadd.f32 %v1131_v28, %v1128_v14  ;;  %v1092_v32 = vmul.f32 %v1091_v61, %v2362_v62  ;;  %v1097_v5 = vmul.f32 %v1096_v36, %v1987_v45  ;;  %s1431_s16 = sshll.u32 %s3284_s13, 3 }
 0x14a   : > { %v1086_v43 = vadd.f32 %v1084_v4, %v1081_v53  ;;  %v1143_v56 = vadd.f32 %v1141_v11, %v1138_v51  ;;  %v1100_v40 = vmul.f32 %v1099_v9, %v2306_v6  ;;  %v1107_v46 = vmul.f32 %v1106_v60, %v2059_v16 }
 0x14b   : > { %v1110_v44 = vmul.f32 %v1109_v55, %v2062_v17  ;;  %v1135_v12 = vadd.f32 %v1133_v41, %v1115_v3  ;;  %v1094_v21 = vadd.f32 %v1092_v32, %v1089_v10  ;;  %v1117_v19 = vmul.f32 %v1116_v30, %v3256_v23 }
 0x14c   : > { %v1120_v47 = vmul.f32 %v1119_v18, %v3257_v13  ;;  %v1145_v53 = vadd.f32 %v1143_v56, %v1125_v57  ;;  %v1102_v61 = vadd.f32 %v1100_v40, %v1097_v5  ;;  %v1127_v36 = vmul.f32 %v1126_v42, %v3258_v24  ;;  %s1206_s15 = scalar_lea.hbm %s3287_s1, %s1431_s16 }
 0x14d   : > { %v1112_v54 = vadd.f32 %v1110_v44, %v1107_v46  ;;  %v1130_v60 = vmul.f32 %v1129_v49, %v2598_v8  ;;  %v1137_v55 = vmul.f32 %v1136_v63, %v2618_v1  ;;  %v1140_v2 = vmul.f32 %v1139_v22, %v2671_v33 }
 0x14e   : > { %v1122_v9 = vadd.f32 %v1120_v47, %v1117_v19  ;;  %v1147_v30 = vadd.f32 %v1145_v53, %v1135_v12  ;;  %v1104_v15 = vadd.f32 %v1102_v61, %v1086_v43  ;;  %v3270_v14 = vstv %s3266_s21  ;;  %s1210_s21 = sshll.u32 %s1206_s15, 4  ;;  %s1211_s21 = int_to_ptr.hbm [resolvable:$true] %s1210_s21 }
 0x14f   : > { %v1114_v18 = vadd.f32 %v1112_v54, %v1094_v21  ;;  %v998_v28 = vmul.f32 %v3270_v14, %v3259_v50  ;;  %v1132_v51 = vadd.f32 %v1130_v60, %v1127_v36  ;;  %v1142_v42 = vadd.f32 %v1140_v2, %v1137_v55 }
 0x150   : > { %v3271_v4 = vstv %s3169_s11  ;;  %v3272_v49 = vstv %s1967_s24  ;;  %1150 = vrot.lane.b32.xlu2 %v1147_v30, %s1724_s3  ;;  %v1124_v63 = vadd.f32 %v1122_v9, %v1104_v15  ;;  %v3273_v22 = vstv %s2079_s14  ;;  %s2894_s24 = sld [smem:[#allocation5 + $0x15]] }
 0x151   : > { %v1001_v3 = vmul.f32 %v3271_v4, %v3260_v35  ;;  %v1006_v57 = vmul.f32 %v3272_v49, %v3261_v38  ;;  %v1009_v11 = vmul.f32 %v3273_v22, %v3262_v59  ;;  %v3274_v10 = vstv %s3267_s19  ;;  %s2898_s14 = sld [smem:[#allocation5 + $0x46]]  ;;  %s3290_s19 = sand.u32 1, %s3286_s8  }
 0x152   : > { %v1014_v41 = vmul.f32 %v3274_v10, %v3263_v25  ;;  %v3275_v43 = vstv %s2072_s30  ;;  %v1134_v5 = vadd.f32 %v1132_v51, %v1114_v18  ;;  %v3276_v40 = vstv %s3268_s29  ;;  %s2896_s30 = sld [smem:[#allocation5 + $0x17]]  ;;  %s1195_s29 = scalar_lea.sflag [#allocation7], %s3290_s19 }
 0x153   : > { %v1017_v32 = vmul.f32 %v3275_v43, %v3264_v29  ;;  %v1003_v56 = vadd.f32 %v1001_v3, %v998_v28  ;;  %v1024_v46 = vmul.f32 %v3276_v40, %v3265_v20  ;;  %v3277_v44 = vstv %s3269_s7  ;;  %s2908_s11 = sld [smem:[#allocation5 + $0x18]]  ;;  %s1644_s7 = sshra.s32 %s1211_s21, 4  ;;  %s1645_s7 = int_to_ptr.hbm [resolvable:$true] %s1644_s7 }
 0x154   : > { %v1027_v12 = vmul.f32 %v3277_v44, %v2077_v26  ;;  %v1144_v21 = vadd.f32 %v1142_v42, %v1124_v63  ;;  %v1011_v19 = vadd.f32 %v1009_v11, %v1006_v57  ;;  %v3278_v53 = vstv %s2175_s6  ;;  %s2902_s6 = sld [smem:[#allocation5 + $0x48]]  ;;  %p1651_p9 = scmp.lt.s32.totalorder %s1645_s7, %s3287_s1 }
 0x155   : > { %v1019_v47 = vadd.f32 %v1017_v32, %v1014_v41  ;;  %v1034_v61 = vmul.f32 %v3278_v53, %v2437_v31  ;;  %v3279_v36 = vstv %s2234_s20  ;;  %v3280_v60 = vstv %s2379_s2  ;;  %s2900_s20 = sld [smem:[#allocation5 + $0x16]] }
 0x156   : > { %v1029_v54 = vadd.f32 %v1027_v12, %v1024_v46  ;;  %v1037_v9 = vmul.f32 %v3279_v36, %v2457_v7  ;;  %v1044_v55 = vmul.f32 %v3280_v60, %v2520_v39  ;;  %v3281_v2 = vstv %s2447_s23  ;;  %s2910_s2 = sld [smem:[#allocation5 + $0x47]] }
 0x157   : > { %v1047_v30 = vmul.f32 %v3281_v2, %v2602_v48  ;;  %v1146_v15 = vadd.f32 %v1144_v21, %v1134_v5  ;;  %v3282_v18 = vstv %s2465_s27  ;;  %v3283_v28 = vstv %s2493_s9  ;;  %s2912_s23 = sld [smem:[#allocation5 + $0x49]] }
 0x158   : > { %v1054_v14 = vmul.f32 %v3282_v18, %v2622_v0  ;;  %v1057_v51 = vmul.f32 %v3283_v28, %v2675_v27  ;;  %v1021_v42 = vadd.f32 %v1019_v47, %v1003_v56  ;;  %v1039_v4 = vadd.f32 %v1037_v9, %v1034_v61  ;;  %s2916_s27 = sld [smem:[#allocation5 + $0x4a]] }
 0x159   : > { %v1049_v3 = vadd.f32 %v1047_v30, %v1044_v55  ;;  %1148 = vrot.lane.b32.xlu1 %v1146_v15, %s1724_s3  ;;  %v1031_v57 = vadd.f32 %v1029_v54, %v1011_v19  ;;  %s2918_s9 = sld [smem:[#allocation5 + $0x19]]  ;;  %v835_v56 = vstv %s2894_s24  ;;  %v851_v40 = vstv %s2896_s30  ;;  %s1646_s3 = scalar_lea.hbm %s1645_s7, 8 }
 0x15a   : > { %v1059_v49 = vadd.f32 %v1057_v51, %v1054_v14  ;;  %v1041_v63 = vadd.f32 %v1039_v4, %v1021_v42  ;;  %v854_v5 = vstv %s2902_s6  ;;  %v838_v12 = vstv %s2898_s14  ;;  %p1647_p1 = scmp.ne.s32.totalorder %s1645_s7, %s1646_s3  ;;  %s1650_s14 = scalar_lea.hbm %s3287_s1, 16 }
 0x15b   : > { %v1051_v22 = vadd.f32 %v1049_v3, %v1031_v57  ;;  %v856_v21 = vmul.f32 %v854_v5, %v3264_v29  ;;  %v837_v47 = vmul.f32 %v835_v56, %v3259_v50  ;;  %v853_v61 = vmul.f32 %v851_v40, %v3263_v25  ;;  %p1652_p10 = scmp.lt.s32.totalorder %s1650_s14, %s1646_s3 }
 0x15c   : > { %v1061_v11 = vadd.f32 %v1059_v49, %v1041_v63  ;;  %v846_v53 = vstv %s2910_s2  ;;  %v861_v54 = vstv %s2908_s11  ;;  %v894_v60 = vstv %s2920_s28  ;;  %p1648_p4 = pnand %p1647_p1, %p1831_p7 }
 0x15d   : > { %v864_v36 = vstv %s2912_s23  ;;  %v839_v2 = vmul.f32 %v838_v12, %v2187_v58  ;;  %v840_v30 = vmul.f32 %v838_v12, %v3260_v35  ;;  %v843_v29 = vstv %s2900_s20  ;;  %p1653_p2 = por %p1652_p10, %p1651_p9 }
 0x15e   : > { %v1063_v10 = vadd.f32 %v1061_v11, %v1051_v22  ;;  %v874_v19 = vstv %s2916_s27  ;;  %v848_v18 = vmul.f32 %v846_v53, %v3262_v59  ;;  %v858_v50 = vadd.f32 %v856_v21, %v853_v61  ;;  %p1649_p8 = pneg %p1648_p4 }
 0x15f   : > { %v871_v9 = vstv %s2918_s9  ;;  %v876_v15 = vmul.f32 %v874_v19, %v2457_v7  ;;  %v884_v14 = vstv %s2922_s10  ;;  %v891_v28 = vstv %s2924_s25 }
 0x160   : > { %1066 = vrot.lane.b32.xlu0 %v1063_v10, %s1722_s26  ;;  %v863_v25 = vmul.f32 %v861_v54, %v3265_v20  ;;  %v866_v51 = vmul.f32 %v864_v36, %v2077_v26  ;;  %v873_v42 = vmul.f32 %v871_v9, %v2437_v31  ;;  %v896_v4 = vmul.f32 %v894_v60, %v2675_v27  ;;  %s284_s26 = scalar_lea.vmem [#allocation13], %s3285_s12  ;;  %p1654_p11 = pnand %p1653_p2, %p1649_p8 }
 0x161   : > { %v836_v58 = vmul.f32 %v835_v56, %v2131_v34  ;;  %v845_v35 = vmul.f32 %v843_v29, %v3261_v38  ;;  %v855_v3 = vmul.f32 %v854_v5, %v2306_v6  ;;  %v881_v7 = vstv %s2927_s22  ;;  %s1208_s5 = sshll.u32 %s284_s26, 4  ;;  %s1209_s5 = int_to_ptr.vmem [resolvable:$true] %s1208_s5 }
 0x162   : > { %v842_v49 = vadd.f32 %v840_v30, %v837_v47  ;;  %v878_v59 = vadd.f32 %v876_v15, %v873_v42  ;;  %v886_v57 = vmul.f32 %v884_v14, %v2602_v48  ;;  %v893_v63 = vmul.f32 %v891_v28, %v2622_v0  ;;  %v827_v42 = vld [vmem:[#allocation9 + $0x2] ss:$8 sm:$0x3] }
 0x163   : > { %v841_v20 = vadd.f32 %v839_v2, %v836_v58  ;;  %v847_v26 = vmul.f32 %v846_v53, %v2362_v62  ;;  %v850_v22 = vadd.f32 %v848_v18, %v845_v35  ;;  %v852_v31 = vmul.f32 %v851_v40, %v1987_v45 }
 0x164   : > { %v860_v34 = vadd.f32 %v858_v50, %v842_v49  ;;  %v868_v11 = vadd.f32 %v866_v51, %v863_v25  ;;  %v883_v38 = vmul.f32 %v881_v7, %v2520_v39  ;;  %v898_v6 = vadd.f32 %v896_v4, %v893_v63 }
 0x165   : > { %v844_v5 = vmul.f32 %v843_v29, %v2213_v52  ;;  %v857_v56 = vadd.f32 %v855_v3, %v852_v31  ;;  %v875_v48 = vmul.f32 %v874_v19, %v3257_v13  ;;  %v862_v62 = vmul.f32 %v861_v54, %v2059_v16 }
 0x166   : > { %v865_v0 = vmul.f32 %v864_v36, %v2062_v17  ;;  %v880_v45 = vadd.f32 %v878_v59, %v860_v34  ;;  %v888_v40 = vadd.f32 %v886_v57, %v883_v38  ;;  %v872_v12 = vmul.f32 %v871_v9, %v3256_v23  ;;  %v988_v57 = vld [vmem:[#allocation9 + $0x4] ss:$8 sm:$0x3]  ;;  %v1156_v34 = vld [vmem:[#allocation9 + $0x6] ss:$8 sm:$0x3] }
 0x167   : > { %v895_v39 = vmul.f32 %v894_v60, %v2671_v33  ;;  %v849_v21 = vadd.f32 %v847_v26, %v844_v5  ;;  %v870_v47 = vadd.f32 %v868_v11, %v850_v22  ;;  %v885_v19 = vmul.f32 %v884_v14, %v2598_v8 }
 0x168   : > { %v900_v13 = vadd.f32 %v898_v6, %v880_v45  ;;  %v877_v17 = vadd.f32 %v875_v48, %v872_v12  ;;  %v892_v23 = vmul.f32 %v891_v28, %v2618_v1  ;;  %v867_v53 = vadd.f32 %v865_v0, %v862_v62  ;;  %v1072_v0 = vld [vmem:[#allocation9 + $0x5] ss:$8 sm:$0x3] }
 0x169   : > { %v890_v61 = vadd.f32 %v888_v40, %v870_v47  ;;  %v859_v36 = vadd.f32 %v857_v56, %v841_v20  ;;  %v882_v9 = vmul.f32 %v881_v7, %v3258_v24  ;;  %v743_v20 = vld [vmem:[#allocation9 + $0x1] ss:$8 sm:$0x3] }
 0x16a   : > { %v897_v60 = vadd.f32 %v895_v39, %v892_v23  ;;  %v869_v14 = vadd.f32 %v867_v53, %v849_v21 }
 0x16b   : > { %v902_v30 = vadd.f32 %v900_v13, %v890_v61  ;;  %v879_v29 = vadd.f32 %v877_v17, %v859_v36  ;;  %v887_v15 = vadd.f32 %v885_v19, %v882_v9 }
 0x16d   : > { %v899_v25 = vadd.f32 %v897_v60, %v879_v29  ;;  %v907_v3 = vrot.slane %v902_v30, 7  ;;  %v889_v59 = vadd.f32 %v887_v15, %v869_v14  ;;  %v3289_v14 = vld [vmem:[#allocation29_spill] sm:$0xff] }
 0x18b   : > { %v2904_v41 = vpop.permute.xlu2 %819 }
 0x193   : > { %v2931_v46 = vpop.permute.xlu2 %737 }
 0x19b   : > { %v2966_v27 = vpop.permute.xlu2 %1064 }
 0x1a3   : > { %v2906_v43 = vpop.permute.xlu1 %653 }
 0x1a4   : > { %v2914_v32 = vpop.permute.xlu0 %651 }
 0x1a5   : > { %v656_v33 = vsel %vm655_vm8, %v2914_v32, %v2906_v43  ;;  %v657_v35 = vsel %vm655_vm8, %v2906_v43, %v2914_v32  ;;  %v901_v32 = vadd.f32 %v899_v25, %v889_v59 }
 0x1a6   : > { %v661_v1 = vrot.slane %v656_v33, 7 }
 0x1a7   : > { %v908_v5 = vsel %vm662_vm12, %v901_v32, %v907_v3 }
 0x1aa   : > { %v1151_v50 = vpop.permute.xlu2 %1150 }
 0x1ab   : > { %v2933_v44 = vpop.permute.xlu1 %735 }
 0x1ac   : > { %v2945_v55 = vpop.permute.xlu0 %821  ;;  %v740_v8 = vsel %vm739_vm10, %v2933_v44, %v2931_v46  ;;  %v741_v26 = vsel %vm739_vm10, %v2931_v46, %v2933_v44 }
 0x1ad   : > { %v824_v16 = vsel %vm823_vm7, %v2904_v41, %v2945_v55  ;;  %v825_v24 = vsel %vm823_vm7, %v2945_v55, %v2904_v41  ;;  %v746_v51 = vrot.slane %v740_v8, 7  ;;  %v658_v41 = vld [vmem:[#allocation9] ss:$8 sm:$0x3]  ;;  %v663_v55 = vsel %vm662_vm12, %v657_v35, %v661_v1 }
 0x1ae   : > { %v830_v2 = vrot.slane %v824_v16, 7  ;;  %v665_v38 = vmul.f32 %v663_v55, %v658_v41  ;;  %v1165_v16 = vstv %s383_s0 }
 0x1af   : > { %v747_v31 = vsel %vm662_vm12, %v741_v26, %v746_v51 }
 0x1b0   : > { %v831_v4 = vsel %vm662_vm12, %v825_v24, %v830_v2  ;;  %v749_v46 = vmul.f32 %v747_v31, %v743_v20 }
 0x1b1   : > { %v833_v22 = vmul.f32 %v831_v4, %v827_v42 }
 0x1b3   : > { %v983_v10 = vpop.permute.xlu1 %982  ;;  %v834_v44 = vadd.f32 %v833_v22, %v665_v38 }
 0x1b7   : > { %v981_v52 = vpop.permute.xlu0 %980 }
 0x1b8   : > { %v986_v54 = vsel %vm984_vm9, %v983_v10, %v981_v52  ;;  %v985_v7 = vsel %vm984_vm9, %v981_v52, %v983_v10  ;;  %v904_v10 = vld [vmem:[#allocation9 + $0x3] ss:$8 sm:$0x3] }
 0x1b9   : > { %v991_v18 = vrot.slane %v986_v54, 7  ;;  %v910_v40 = vmul.f32 %v908_v5, %v904_v10 }
 0x1bb   : > { %v992_v63 = vsel %vm662_vm12, %v985_v7, %v991_v18  ;;  %v911_v52 = vadd.f32 %v910_v40, %v749_v46 }
 0x1bc   : > { %v994_v6 = vmul.f32 %v992_v63, %v988_v57 }
 0x1be   : > { %v995_v12 = vadd.f32 %v994_v6, %v834_v44 }
 0x1cb   : > { %v1149_v28 = vpop.permute.xlu1 %1148 }
 0x1cc   : > { %v1154_v58 = vsel %vm1152_vm11, %v1151_v50, %v1149_v28  ;;  %v1153_v43 = vsel %vm1152_vm11, %v1149_v28, %v1151_v50 }
 0x1cd   : > { %v1159_v49 = vrot.slane %v1154_v58, 7 }
 0x1cf   : > { %v1160_v11 = vsel %vm662_vm12, %v1153_v43, %v1159_v49 }
 0x1d0   : > { %v1162_v48 = vmul.f32 %v1160_v11, %v1156_v34 }
 0x1d2   : > { %v1067_v56 = vpop.permute.xlu0 %1066  ;;  %v1163_v21 = vadd.f32 %v1162_v48, %v995_v12 }
 0x1d3   : > { %v1070_v62 = vsel %vm1068_vm13, %v1067_v56, %v2966_v27  ;;  %v1069_v39 = vsel %vm1068_vm13, %v2966_v27, %v1067_v56 }
 0x1d4   : > { %v1075_v45 = vrot.slane %v1070_v62, 7 }
 0x1d6   : > { %v1076_v37 = vsel %vm662_vm12, %v1069_v39, %v1075_v45 }
 0x1d7   : > { %v1078_v47 = vmul.f32 %v1076_v37, %v1072_v0 }
 0x1d9   : > { %v1079_v13 = vadd.f32 %v1078_v47, %v911_v52 }
 0x1db   : > { %v1164_v17 = vadd.f32 %v1163_v21, %v1079_v13 }
 0x1dd   : > { %v1166_v19 = vadd.f32 %v1165_v16, %v1164_v17 }
 0x1df   : > { %v1424_v23 = vmul.f32 -1.442695, %v1166_v19 }
 0x1e1   : > { %1521 = vpow2.f32 %v1424_v23 }
 0x1e7   : > { %v1522_v33 = vpop.eup %1521 }
 0x1e8   : > { %v1170_v53 = vadd.f32 1.0, %v1522_v33 }
 0x1ea   : > { %1523 = vrcp.f32 %v1170_v53  ;;  %v1182_v9 = vand.u32 2147483648, %v1170_v53  ;;  %v1180_v60 = vand.u32 2147483647, %v1170_v53  ;;  %vm1176_vm15 = vweird.f32 %v1170_v53 }
 0x1ec   : > { %v1183_v30 = vor.u32 1.1754944e-38, %v1182_v9  ;;  %vm1181_vm2 = vcmp.eq.f32.partialorder %v1180_v60, 8.507059e+37 }
 0x1f0   : > { %v1524_v61 = vpop.eup %1523 }
 0x1f1   : > { %v1172_v54 = vmul.f32 %v1524_v61, %v1170_v53  ;;  %vm1177_vm14 = vweird.f32 %v1524_v61 }
 0x1f2   : > { %vm1178_vm1 = vmor %vm1176_vm15, %vm1177_vm14 }
 0x1f3   : > { %v1173_v36 = vsub.f32 1.0, %v1172_v54 }
 0x1f5   : > { %v1174_v27 = vmul.f32 %v1524_v61, %v1173_v36 }
 0x1f7   : > { %v1175_v2 = vadd.f32 %v1524_v61, %v1174_v27 }
 0x1f9   : > { %v1179_v8 = vsel %vm1178_vm1, %v1524_v61, %v1175_v2 }
 0x1fa   : > { %v1184_v1 = vsel %vm1181_vm2, %v1183_v30, %v1179_v8 }
 0x1fb   : > { %v1188_v29 = vperm.slane %v1184_v1, 1  ;;  %v1187_v15 = vperm.slane %v1184_v1, 0 }
 0x1fd   : > { %v1189_v18 = vrot.slane %v1188_v29, 4 }
 0x1ff   : > { %v1190_v50 = vsel %vm391_vm0, %v1187_v15, %v1189_v18 }
 0x200   : > { %v1192_v24 = vmul.f32 %v1190_v50, %v3289_v14 }
 0x202   : > { %1193 = vst [vmem:[%s284_s26] sm:$0xff] %v1192_v24 }
 0x203   : > { %1657 = shalt.err (!%p1654_p11)
}
 0x204   : > { %1446 = dma.vmem_to_hbm [thread:$0]  (%p1831_p7), %s1209_s5, 128, %s1211_s21, %s1195_s29  }
 0x205 PF: > { %s3291_s11 = sld [smem:[#allocation19_spill]] }
 0x206   : > { %s3293_s23 = sld [smem:[#allocation22_spill]] }
 0x20b   : > { %s1222_s27 = sand.u32 1, %s3291_s11  }
 0x20c   : > { %p3294_p12 = scmp.ge.s32.totalorder %s3293_s23, 2  ;;  %s1223_s9 = scalar_lea.sflag [#allocation7], %s1222_s27 }
 0x20e   : > { %p1463_p13 = pnand %p3294_p12, %p1793_p6 }
 0x210   : > { %p1464_p0 = pneg %p1463_p13 }
 0x212   : > { %1691 = dma.done.wait (%p1464_p0), %s1223_s9, 128  }
 0x213   : > { %1693 = vsyncadd (%p1464_p0), %s1223_s9, 4294967168  ;;  %s3295_s23 = sld [smem:[#allocation25_spill]] }
 0x214   : > { %s3296_s20 = sld [smem:[#allocation20_spill]] }
 0x215   : > { %s3297_s21 = sld [smem:[#allocation21_spill]] }
 0x216   : > { %s3298_s22 = sld [smem:[#allocation26_spill]] }
 0x219   : > { %p19_p3 = scmp.ge.s32.totalorder %s3295_s23, 4  }
 0x21b   :  { %21 = sbr.rel (!%p19_p3) target bundleno = 13 (0xd), region = 109 }
 0x220   :  { %1229 = vsyncpa [#allocation6], 1 }
 0x221   :  { %1231 = vsyncpa [#allocation6 + $0x1], 1 }
 0x222   :  { %1232 = vsyncpa [#allocation11], 1 }
 0x223   :  { %1233 = vsyncpa [#allocation7], 1 }
 0x224   :  { %1235 = vsyncpa [#allocation7 + $0x1], 1 }
 0x225   :  { %1236 = vsyncpa [#allocation8], 1 }
 0x226   :  { %1238 = vsyncpa [#allocation8 + $0x1], 1 }

</bundles_post_ra>
